<compile_context>
chip_gen: v6e
topology: v6e:2x2x1
jax: 0.10.0
libtpu: 0.0.40
codegen_flags: <defaults>
</compile_context>

<pallas_src>
import jax
import jax.numpy as jnp
from jax.experimental import pallas as pl
from jax.experimental.pallas import tpu as pltpu

HEAD_PAD = 128  # lane-dense padded width of the classifier head


def mlp_kernel(x_ref, w1_ref, b1_ref, w2_ref, b2_ref, w3_ref, b3_ref, o_ref):
    # x arrives f32 (cheaper HBM traffic than a wrapper-side bf16 cast); cast
    # to bf16 on the VPU right before the MXU.  All dots accumulate in f32.
    x = x_ref[...].astype(jnp.bfloat16)

    h1 = jnp.dot(x, w1_ref[...], preferred_element_type=jnp.float32) + b1_ref[...]
    h1 = jnp.maximum(h1, 0.0).astype(jnp.bfloat16)

    h2 = jnp.dot(h1, w2_ref[...], preferred_element_type=jnp.float32) + b2_ref[...]
    h2 = jnp.maximum(h2, 0.0).astype(jnp.bfloat16)

    logits = jnp.dot(h2, w3_ref[...], preferred_element_type=jnp.float32) + b3_ref[...]
    o_ref[...] = logits.astype(o_ref.dtype)  # (tm, HEAD_PAD) lane-dense store


def _choose_tm(n, tm):
    """Batch-tile heuristic: full batch at tiny N, >= 2 parallel steps once the
    batch is big enough that splitting it across v7x's two TCs pays off."""
    if n <= tm:
        if n >= 256:
            half = -(-n // 2)                 # ceil(n / 2)
            return max(16, -(-half // 16) * 16)  # round up to a multiple of 16
        return n
    return tm


def neural_network_forward(x_nchw, params, *, n_labels=3, tm=512):
    """x_nchw: (N, C, H, W) float32.
    params: w1 (D_in,512) bf16, w2 (512,512) bf16, w3 (512,HEAD_PAD) bf16
            (columns >= n_labels are zero); b1/b2 (1,512) f32, b3 (1,HEAD_PAD)
            f32 (columns >= n_labels are zero)."""
    n = x_nchw.shape[0]
    # nn.Flatten on NCHW == row-major reshape.  Keep f32; the kernel casts.
    x_flat = x_nchw.reshape(n, -1)

    w1, b1 = params["w1"], params["b1"]
    w2, b2 = params["w2"], params["b2"]
    w3, b3 = params["w3"], params["b3"]

    d_in = w1.shape[0]
    hidden = w1.shape[1]
    out_pad = w3.shape[1]  # HEAD_PAD

    tm = _choose_tm(n, tm)
    grid = (pl.cdiv(n, tm),)
    vmem_limit = (32 << 20) if tm >= 1024 else (16 << 20)

    # Weights / biases: constant index_map -> resident in VMEM across grid steps.
    resident = lambda shape: pl.BlockSpec(shape, lambda i: (0, 0))

    out_padded = pl.pallas_call(
        mlp_kernel,
        out_shape=jax.ShapeDtypeStruct((n, out_pad), jnp.float32),
        grid=grid,
        in_specs=[
            pl.BlockSpec((tm, d_in), lambda i: (i, 0)),
            resident((d_in, hidden)),
            resident((1, hidden)),
            resident((hidden, hidden)),
            resident((1, hidden)),
            resident((hidden, out_pad)),
            resident((1, out_pad)),
        ],
        out_specs=pl.BlockSpec((tm, out_pad), lambda i: (i, 0)),
        compiler_params=pltpu.CompilerParams(
            dimension_semantics=("parallel",),
            vmem_limit_bytes=vmem_limit,
        ),
    )(x_flat, w1, b1, w2, b2, w3, b3)

    # Drop the zero-padded logit columns before returning to the caller.
    return out_padded[:, :n_labels]


def init_params(key, d_in, hidden, n_labels, head_pad=HEAD_PAD):
    """Deterministic synthetic init (PyTorch Linear stores W as (out, in); we
    use (in, out)).  Weights bf16, biases f32; head zero-padded to head_pad."""
    k1, k2, k3, k4, k5, k6 = jax.random.split(key, 6)
    s1 = 1.0 / jnp.sqrt(d_in)
    s2 = 1.0 / jnp.sqrt(hidden)

    w3_full = jax.random.uniform(k5, (hidden, n_labels), jnp.float32, -s2, s2)
    b3_full = jax.random.uniform(k6, (1, n_labels), jnp.float32, -s2, s2)
    w3 = jnp.zeros((hidden, head_pad), jnp.float32).at[:, :n_labels].set(w3_full)
    b3 = jnp.zeros((1, head_pad), jnp.float32).at[:, :n_labels].set(b3_full)

    return {
        "w1": jax.random.uniform(k1, (d_in, hidden), jnp.float32, -s1, s1).astype(jnp.bfloat16),
        "b1": jax.random.uniform(k2, (1, hidden), jnp.float32, -s1, s1),
        "w2": jax.random.uniform(k3, (hidden, hidden), jnp.float32, -s2, s2).astype(jnp.bfloat16),
        "b2": jax.random.uniform(k4, (1, hidden), jnp.float32, -s2, s2),
        "w3": w3.astype(jnp.bfloat16),
        "b3": b3,
    }


if __name__ == "__main__":
    # Small shapes consistent with the module's forward:
    # batch=2, channels=3, spatial=16x16 -> D_in = 3*16*16 = 768,
    # hidden = 512 (as in the module), num_labels = 3.
    batch, channels, img_h, img_w = 2, 3, 16, 16
    hidden, num_labels = 512, 3
    d_in = channels * img_h * img_w

    key = jax.random.PRNGKey(0)
    kx, kp = jax.random.split(key)
    x = jax.random.normal(kx, (batch, channels, img_h, img_w), jnp.float32)
    params = init_params(kp, d_in, hidden, num_labels)

    logits = neural_network_forward(x, params, n_labels=num_labels)
    jax.block_until_ready(logits)

    # Pure-JAX reference with the same bf16-storage / f32-accumulate recipe,
    # using the unpadded head columns.
    xf = x.reshape(batch, -1).astype(jnp.bfloat16)
    h1 = jnp.maximum(
        jnp.dot(xf, params["w1"], preferred_element_type=jnp.float32) + params["b1"], 0.0
    ).astype(jnp.bfloat16)
    h2 = jnp.maximum(
        jnp.dot(h1, params["w2"], preferred_element_type=jnp.float32) + params["b2"], 0.0
    ).astype(jnp.bfloat16)
    ref = (
        jnp.dot(h2, params["w3"][:, :num_labels], preferred_element_type=jnp.float32)
        + params["b3"][:, :num_labels]
    )

    assert logits.shape == (batch, num_labels)
    assert logits.dtype == jnp.float32
    assert jnp.allclose(logits, ref, atol=1e-2, rtol=1e-2)

    print("KERNEL_OK")
</pallas_src>

<mosaic_0001>
module attributes {stable_mosaic.version = 11 : i64} {
  func.func @mlp_kernel(%arg0: i32, %arg1: memref<2x768xf32, #tpu.memory_space<vmem>>, %arg2: memref<768x512xbf16, #tpu.memory_space<vmem>>, %arg3: memref<1x512xf32, #tpu.memory_space<vmem>>, %arg4: memref<512x512xbf16, #tpu.memory_space<vmem>>, %arg5: memref<1x512xf32, #tpu.memory_space<vmem>>, %arg6: memref<512x128xbf16, #tpu.memory_space<vmem>>, %arg7: memref<1x128xf32, #tpu.memory_space<vmem>>, %arg8: memref<2x128xf32, #tpu.memory_space<vmem>>) attributes {dimension_semantics = [#tpu.dimension_semantics<parallel>], iteration_bounds = array<i64: 1>, scalar_prefetch = 0 : i64, scratch_operands = 0 : i64, tpu.core_type = #tpu.core_type<tc>, window_params = [{transform_indices = @transform_0, window_bounds = array<i64: 2, 768>}, {pipeline_mode = #tpu.pipeline_mode<synchronous>, transform_indices = @transform_1, window_bounds = array<i64: 768, 512>}, {pipeline_mode = #tpu.pipeline_mode<synchronous>, transform_indices = @transform_2, window_bounds = array<i64: 1, 512>}, {pipeline_mode = #tpu.pipeline_mode<synchronous>, transform_indices = @transform_3, window_bounds = array<i64: 512, 512>}, {pipeline_mode = #tpu.pipeline_mode<synchronous>, transform_indices = @transform_4, window_bounds = array<i64: 1, 512>}, {pipeline_mode = #tpu.pipeline_mode<synchronous>, transform_indices = @transform_5, window_bounds = array<i64: 512, 128>}, {pipeline_mode = #tpu.pipeline_mode<synchronous>, transform_indices = @transform_6, window_bounds = array<i64: 1, 128>}, {transform_indices = @transform_7, window_bounds = array<i64: 2, 128>}]} {
    %c0 = arith.constant 0 : index
    %c0_0 = arith.constant 0 : index
    %0 = vector.load %arg1[%c0, %c0_0] : memref<2x768xf32, #tpu.memory_space<vmem>>, vector<2x768xf32>
    %1 = arith.truncf %0 : vector<2x768xf32> to vector<2x768xbf16>
    %c0_1 = arith.constant 0 : index
    %c0_2 = arith.constant 0 : index
    %2 = vector.load %arg2[%c0_1, %c0_2] : memref<768x512xbf16, #tpu.memory_space<vmem>>, vector<768x512xbf16>
    %cst = arith.constant dense<0.000000e+00> : vector<2x512xf32>
    %3 = tpu.matmul %1, %2, %cst {dimension_numbers = #tpu.dot_dimension_numbers<[1], [0], [0], [1], [0, 0, 1, 1], [], []>} : vector<2x768xbf16>, vector<768x512xbf16>, vector<2x512xf32> -> vector<2x512xf32>
    %c0_3 = arith.constant 0 : index
    %c0_4 = arith.constant 0 : index
    %4 = vector.load %arg3[%c0_3, %c0_4] : memref<1x512xf32, #tpu.memory_space<vmem>>, vector<1x512xf32>
    %5 = vector.broadcast %4 : vector<1x512xf32> to vector<2x512xf32>
    %6 = arith.addf %3, %5 : vector<2x512xf32>
    %cst_5 = arith.constant 0.000000e+00 : f32
    %7 = vector.broadcast %cst_5 : f32 to vector<2x512xf32>
    %8 = arith.maximumf %6, %7 : vector<2x512xf32>
    %9 = arith.truncf %8 : vector<2x512xf32> to vector<2x512xbf16>
    %c0_6 = arith.constant 0 : index
    %c0_7 = arith.constant 0 : index
    %10 = vector.load %arg4[%c0_6, %c0_7] : memref<512x512xbf16, #tpu.memory_space<vmem>>, vector<512x512xbf16>
    %cst_8 = arith.constant dense<0.000000e+00> : vector<2x512xf32>
    %11 = tpu.matmul %9, %10, %cst_8 {dimension_numbers = #tpu.dot_dimension_numbers<[1], [0], [0], [1], [0, 0, 1, 1], [], []>} : vector<2x512xbf16>, vector<512x512xbf16>, vector<2x512xf32> -> vector<2x512xf32>
    %c0_9 = arith.constant 0 : index
    %c0_10 = arith.constant 0 : index
    %12 = vector.load %arg5[%c0_9, %c0_10] : memref<1x512xf32, #tpu.memory_space<vmem>>, vector<1x512xf32>
    %13 = vector.broadcast %12 : vector<1x512xf32> to vector<2x512xf32>
    %14 = arith.addf %11, %13 : vector<2x512xf32>
    %cst_11 = arith.constant 0.000000e+00 : f32
    %15 = vector.broadcast %cst_11 : f32 to vector<2x512xf32>
    %16 = arith.maximumf %14, %15 : vector<2x512xf32>
    %17 = arith.truncf %16 : vector<2x512xf32> to vector<2x512xbf16>
    %c0_12 = arith.constant 0 : index
    %c0_13 = arith.constant 0 : index
    %18 = vector.load %arg6[%c0_12, %c0_13] : memref<512x128xbf16, #tpu.memory_space<vmem>>, vector<512x128xbf16>
    %cst_14 = arith.constant dense<0.000000e+00> : vector<2x128xf32>
    %19 = tpu.matmul %17, %18, %cst_14 {dimension_numbers = #tpu.dot_dimension_numbers<[1], [0], [0], [1], [0, 0, 1, 1], [], []>} : vector<2x512xbf16>, vector<512x128xbf16>, vector<2x128xf32> -> vector<2x128xf32>
    %c0_15 = arith.constant 0 : index
    %c0_16 = arith.constant 0 : index
    %20 = vector.load %arg7[%c0_15, %c0_16] : memref<1x128xf32, #tpu.memory_space<vmem>>, vector<1x128xf32>
    %21 = vector.broadcast %20 : vector<1x128xf32> to vector<2x128xf32>
    %22 = arith.addf %19, %21 : vector<2x128xf32>
    %c0_17 = arith.constant 0 : index
    %c0_18 = arith.constant 0 : index
    %23 = vector.load %arg8[%c0_17, %c0_18] : memref<2x128xf32, #tpu.memory_space<vmem>>, vector<2x128xf32>
    tpu.vector_store %arg8[%c0_17, %c0_18], %22 {strides = array<i32>} : memref<2x128xf32, #tpu.memory_space<vmem>>, vector<2x128xf32>,
    return
  }
  func.func @transform_0(%arg0: i32) -> (i32, i32) {
    %c0_i32 = arith.constant 0 : i32
    %c0_i32_0 = arith.constant 0 : i32
    return %arg0, %c0_i32 : i32, i32
  }
  func.func @transform_1(%arg0: i32) -> (i32, i32) {
    %c0_i32 = arith.constant 0 : i32
    %c0_i32_0 = arith.constant 0 : i32
    %c0_i32_1 = arith.constant 0 : i32
    return %c0_i32, %c0_i32_0 : i32, i32
  }
  func.func @transform_2(%arg0: i32) -> (i32, i32) {
    %c0_i32 = arith.constant 0 : i32
    %c0_i32_0 = arith.constant 0 : i32
    %c0_i32_1 = arith.constant 0 : i32
    return %c0_i32, %c0_i32_0 : i32, i32
  }
  func.func @transform_3(%arg0: i32) -> (i32, i32) {
    %c0_i32 = arith.constant 0 : i32
    %c0_i32_0 = arith.constant 0 : i32
    %c0_i32_1 = arith.constant 0 : i32
    return %c0_i32, %c0_i32_0 : i32, i32
  }
  func.func @transform_4(%arg0: i32) -> (i32, i32) {
    %c0_i32 = arith.constant 0 : i32
    %c0_i32_0 = arith.constant 0 : i32
    %c0_i32_1 = arith.constant 0 : i32
    return %c0_i32, %c0_i32_0 : i32, i32
  }
  func.func @transform_5(%arg0: i32) -> (i32, i32) {
    %c0_i32 = arith.constant 0 : i32
    %c0_i32_0 = arith.constant 0 : i32
    %c0_i32_1 = arith.constant 0 : i32
    return %c0_i32, %c0_i32_0 : i32, i32
  }
  func.func @transform_6(%arg0: i32) -> (i32, i32) {
    %c0_i32 = arith.constant 0 : i32
    %c0_i32_0 = arith.constant 0 : i32
    %c0_i32_1 = arith.constant 0 : i32
    return %c0_i32, %c0_i32_0 : i32, i32
  }
  func.func @transform_7(%arg0: i32) -> (i32, i32) {
    %c0_i32 = arith.constant 0 : i32
    %c0_i32_0 = arith.constant 0 : i32
    return %arg0, %c0_i32 : i32, i32
  }
}

</mosaic_0001>

<bundles_post_ra>
// kernel: tpu_custom_call.1
= control target key start
LH: loop header
LB: loop body
LE: loop exit
PB: predicated region body
PF: predicated region fallthrough
CT: control target
= control target key end

     0   :  { %12 = vsyncpa [#allocation3], 0  ;;  %s4078_s0 = inlined_call_operand.hbm [shape: f32[2,768], index: 0, kind: input, shape index: {}]   ;;  %s4079_s1 = inlined_call_operand.hbm [shape: bf16[768,512], index: 1, kind: input, shape index: {}]   ;;  %s4080_s2 = inlined_call_operand.hbm [shape: f32[1,512], index: 2, kind: input, shape index: {}]   ;;  %s4081_s3 = inlined_call_operand.hbm [shape: bf16[512,512], index: 3, kind: input, shape index: {}]   ;;  %s4082_s4 = inlined_call_operand.vmem [shape: f32[1,512], index: 4, kind: input, shape index: {}]   ;;  %s4083_s5 = inlined_call_operand.hbm [shape: bf16[512,128], index: 5, kind: input, shape index: {}]   ;;  %s4084_s6 = inlined_call_operand.vmem [shape: f32[1,128], index: 6, kind: input, shape index: {}]   ;;  %s4085_s7 = inlined_call_operand.hbm [shape: f32[2,128], index: 7, kind: output, shape index: {}]  }
   0x1   :  { %13 = vsyncpa [#allocation6], 0 }
   0x2   :  { %14 = vsyncpa [#allocation9], 0 }
   0x3   :  { %15 = vsyncpa [#allocation4], 0  ;;  %s3934_s24 = smov [#allocation5]  }
   0x4   :  { %s31_s25 = sshll.u32 %s3934_s24, 4  ;;  %s32_s25 = int_to_ptr.vmem [resolvable:$true] %s31_s25 }
   0x5   :  { %s3814_s26 = scalar_lea.vmem %s32_s25, 24576  ;;  %p3819_p1 = scmp.lt.s32.totalorder %s32_s25, %s32_s25 }
   0x6   :  { %p3815_p0 = scmp.ne.s32.totalorder %s32_s25, %s3814_s26  ;;  %p3820_p2 = scmp.lt.s32.totalorder %s3814_s26, %s3814_s26 }
   0x8   :  { %p3821_p3 = por %p3820_p2, %p3819_p1 }
   0xa   :  { %p3822_p4 = pnand %p3821_p3, %p3815_p0 }
   0xc   :  { %3825 = shalt.err (!%p3822_p4)
}
   0xd   :  { %s3935_s27 = smov 256   ;;  %s3936_s28 = smov 16  }
   0xe   :  { %37 = dma.hbm_to_vmem [thread:$0]  %s4079_s1, 24576, %s32_s25, [#allocation6], %s3935_s27, %s3935_s27, %s3936_s28  }
   0xf   :  { %s3937_s8 = smov [#allocation8]   ;;  %s3938_s10 = smov [#allocation2]  }
  0x10   :  { %s53_s9 = sshll.u32 %s3937_s8, 4  ;;  %s22_s11 = sshll.u32 %s3938_s10, 4  ;;  %s54_s9 = int_to_ptr.vmem [resolvable:$true] %s53_s9  ;;  %s23_s11 = int_to_ptr.vmem [resolvable:$true] %s22_s11 }
  0x11   :  { %s3834_s12 = scalar_lea.vmem %s54_s9, 16384  ;;  %p3839_p6 = scmp.lt.s32.totalorder %s54_s9, %s54_s9 }
  0x12   :  { %p3835_p5 = scmp.ne.s32.totalorder %s54_s9, %s3834_s12  ;;  %p3840_p7 = scmp.lt.s32.totalorder %s3834_s12, %s3834_s12 }
  0x14   :  { %p3841_p8 = por %p3840_p7, %p3839_p6 }
  0x16   :  { %p3842_p9 = pnand %p3841_p8, %p3835_p5 }
  0x18   :  { %3845 = shalt.err (!%p3842_p9)
}
  0x19   :  { %59 = dma.hbm_to_vmem [thread:$0]  %s4081_s3, 16384, %s54_s9, [#allocation9], %s3935_s27, %s3935_s27, %s3936_s28  }
  0x1a   :  { %s3854_s15 = scalar_lea.vmem %s23_s11, 192  ;;  %p3859_p11 = scmp.lt.s32.totalorder %s23_s11, %s23_s11 }
  0x1b   :  { %p3855_p10 = scmp.ne.s32.totalorder %s23_s11, %s3854_s15  ;;  %p3860_p12 = scmp.lt.s32.totalorder %s3854_s15, %s3854_s15 }
  0x1d   :  { %p3861_p13 = por %p3860_p12, %p3859_p11 }
  0x1f   :  { %p3862_p0 = pnand %p3861_p13, %p3855_p10 }
  0x21   :  { %3865 = shalt.err (!%p3862_p0)
}
  0x22   :  { %25 = dma.hbm_to_vmem [thread:$0]  %s4078_s0, 192, %s23_s11, [#allocation3]  }
  0x23   :  { %s3939_s17 = smov [#allocation7]   ;;  %s3940_s19 = smov [#allocation10]  }
  0x24   :  { %s44_s18 = sshll.u32 %s3939_s17, 4  ;;  %s67_s20 = sshll.u32 %s3940_s19, 4  ;;  %s45_s18 = int_to_ptr.vmem [resolvable:$true] %s44_s18  ;;  %s68_s20 = int_to_ptr.vmem [resolvable:$true] %s67_s20 }
  0x25   :  { %s3874_s21 = scalar_lea.vmem %s45_s18, 64  ;;  %p3879_p2 = scmp.lt.s32.totalorder %s45_s18, %s45_s18 }
  0x26   :  { %p3875_p1 = scmp.ne.s32.totalorder %s45_s18, %s3874_s21  ;;  %p3880_p3 = scmp.lt.s32.totalorder %s3874_s21, %s3874_s21 }
  0x28   :  { %p3881_p4 = por %p3880_p3, %p3879_p2 }
  0x2a   :  { %p3882_p5 = pnand %p3881_p4, %p3875_p1 }
  0x2c   :  { %3885 = shalt.err (!%p3882_p5)
}
  0x2d   :  { %47 = dma.hbm_to_vmem [thread:$0]  %s4080_s2, 64, %s45_s18, [#allocation6]  }
  0x2e   :  { %s3894_s23 = scalar_lea.vmem %s68_s20, 4096  ;;  %p3899_p7 = scmp.lt.s32.totalorder %s68_s20, %s68_s20 }
  0x2f   :  { %p3895_p6 = scmp.ne.s32.totalorder %s68_s20, %s3894_s23  ;;  %p3900_p8 = scmp.lt.s32.totalorder %s3894_s23, %s3894_s23 }
  0x31   :  { %p3901_p9 = por %p3900_p8, %p3899_p7 }
  0x33   :  { %p3902_p10 = pnand %p3901_p9, %p3895_p6 }
  0x35   :  { %3905 = shalt.err (!%p3902_p10)
}
  0x36   :  { %s3941_s0 = smov 64   ;;  %s3942_s24 = smov 4  }
  0x37   :  { %73 = dma.hbm_to_vmem [thread:$0]  %s4083_s5, 4096, %s68_s20, [#allocation9], %s3941_s0, %s3941_s0, %s3942_s24  }
  0x38   :  { %3926 = dma.done.wait [#allocation3], 192  }
  0x39   :  { %3927 = vsyncadd [#allocation3], 4294967104 }
  0x3a   :  { %3928 = dma.done.wait [#allocation6], 24640  }
  0x3b   :  { %3929 = vsyncadd [#allocation6], 4294942656 }
  0x3c   :  { %3930 = dma.done.wait [#allocation9], 20480  }
  0x3d   :  { %3931 = vsyncadd [#allocation9], 4294946816  ;;  %v3293_v0 = vld [vmem:[#allocation5 + $0xe4] ss:$16 sps:$4 sm:$0xff]   ;;  %v3297_v2 = vld [vmem:[#allocation5 + $0xe0] ss:$16 sps:$4 sm:$0xff]   ;;  %v100_v38 = vlaneseq }
  0x3e   :  { %v3295_v1 = vld [vmem:[#allocation5 + $0x2e4] ss:$16 sps:$4 sm:$0xff]   ;;  %1307 = vmatprep.subr.bf16.mxu0 %v3293_v0  ;;  %v3298_v3 = vld [vmem:[#allocation5 + $0x2e0] ss:$16 sps:$4 sm:$0xff]   ;;  %v3943_v36 = vmov 1983009808  }
  0x3f   :  { %1348 = vmatprep.subr.bf16.mxu1 %v3295_v1  ;;  %v3299_v4 = vld [vmem:[#allocation5 + $0xc4] ss:$16 sps:$4 sm:$0xff]   ;;  %1308 = vmatpush1.bf16.msra.mxu0 %v3297_v2  ;;  %v3303_v6 = vld [vmem:[#allocation5 + $0xc0] ss:$16 sps:$4 sm:$0xff]   ;;  %v98_v37 = vunpack.c.l.s4 %v3943_v36  ;;  %v4000_v43 = vshrl.u32 %v100_v38, 7  ;;  %s3944_s28 = smov [#allocation11]  }
  0x40   :  { %1349 = vmatpush1.bf16.msra.mxu1 %v3298_v3  ;;  %v3301_v5 = vld [vmem:[#allocation5 + $0x2c4] ss:$16 sps:$4 sm:$0xff]   ;;  %1309 = vmatprep.subr.bf16.mxu0 %v3299_v4  ;;  %v3304_v7 = vld [vmem:[#allocation5 + $0x2c0] ss:$16 sps:$4 sm:$0xff]   ;;  %s2873_s29 = sshll.u32 %s3944_s28, 4  ;;  %s2874_s29 = int_to_ptr.vmem [resolvable:$true] %s2873_s29 }
  0x41   :  { %1350 = vmatprep.subr.bf16.mxu1 %v3301_v5  ;;  %v3305_v8 = vld [vmem:[#allocation5 + $0xa4] ss:$16 sps:$4 sm:$0xff]   ;;  %v3309_v10 = vld [vmem:[#allocation5 + $0xa0] ss:$16 sps:$4 sm:$0xff]   ;;  %v99_v42 = vunpack.c.0.s8 %v98_v37  ;;  %v3425_v37 = vld [vmem:[#allocation5 + $0x4c] ss:$16 sps:$4 sm:$0xff]   ;;  %p3911_p12 = scmp.lt.s32.totalorder %s2874_s29, %s2874_s29 }
  0x42   :  { %v3307_v9 = vld [vmem:[#allocation5 + $0x2a4] ss:$16 sps:$4 sm:$0xff]   ;;  %v3310_v11 = vld [vmem:[#allocation5 + $0x2a0] ss:$16 sps:$4 sm:$0xff]   ;;  %s3906_s30 = scalar_lea.vmem %s2874_s29, 32 }
  0x43   :  { %1310 = vmatpush1.bf16.msra.mxu0 %v3303_v6  ;;  %v3311_v12 = vld [vmem:[#allocation5 + $0x84] ss:$16 sps:$4 sm:$0xff]   ;;  %v3315_v14 = vld [vmem:[#allocation5 + $0x80] ss:$16 sps:$4 sm:$0xff]   ;;  %v102_v49 = vsub.s32 %v99_v42, %v4000_v43  ;;  %p3907_p11 = scmp.ne.s32.totalorder %s2874_s29, %s3906_s30  ;;  %p3912_p13 = scmp.lt.s32.totalorder %s3906_s30, %s3906_s30 }
  0x44   :  { %1351 = vmatpush1.bf16.msra.mxu1 %v3304_v7  ;;  %1311 = vmatprep.subr.bf16.mxu0 %v3305_v8  ;;  %v3313_v13 = vld [vmem:[#allocation5 + $0x284] ss:$16 sps:$4 sm:$0xff]   ;;  %v3316_v15 = vld [vmem:[#allocation5 + $0x280] ss:$16 sps:$4 sm:$0xff]  }
  0x45   :  { %1352 = vmatprep.subr.bf16.mxu1 %v3307_v9  ;;  %v3317_v16 = vld [vmem:[#allocation5 + $0x64] ss:$16 sps:$4 sm:$0xff]   ;;  %v3321_v18 = vld [vmem:[#allocation5 + $0x60] ss:$16 sps:$4 sm:$0xff]   ;;  %p3913_p0 = por %p3912_p13, %p3911_p12 }
  0x46   :  { %v3319_v17 = vld [vmem:[#allocation5 + $0x264] ss:$16 sps:$4 sm:$0xff]   ;;  %v3322_v19 = vld [vmem:[#allocation5 + $0x260] ss:$16 sps:$4 sm:$0xff]  }
  0x47   :  { %1312 = vmatpush1.bf16.msra.mxu0 %v3309_v10  ;;  %v3323_v20 = vld [vmem:[#allocation5 + $0x44] ss:$16 sps:$4 sm:$0xff]   ;;  %v3327_v22 = vld [vmem:[#allocation5 + $0x40] ss:$16 sps:$4 sm:$0xff]   ;;  %p3914_p1 = pnand %p3913_p0, %p3907_p11 }
  0x48   :  { %1353 = vmatpush1.bf16.msra.mxu1 %v3310_v11  ;;  %1313 = vmatprep.subr.bf16.mxu0 %v3311_v12  ;;  %v3325_v21 = vld [vmem:[#allocation5 + $0x244] ss:$16 sps:$4 sm:$0xff]   ;;  %v3328_v23 = vld [vmem:[#allocation5 + $0x240] ss:$16 sps:$4 sm:$0xff]  }
  0x49   :  { %1354 = vmatprep.subr.bf16.mxu1 %v3313_v13  ;;  %v3329_v24 = vld [vmem:[#allocation5 + $0x24] ss:$16 sps:$4 sm:$0xff]   ;;  %v3333_v26 = vld [vmem:[#allocation5 + $0x20] ss:$16 sps:$4 sm:$0xff]  }
  0x4a   :  { %v3331_v25 = vld [vmem:[#allocation5 + $0x224] ss:$16 sps:$4 sm:$0xff]   ;;  %v3334_v27 = vld [vmem:[#allocation5 + $0x220] ss:$16 sps:$4 sm:$0xff]  }
  0x4b   :  { %1314 = vmatpush1.bf16.msra.mxu0 %v3315_v14  ;;  %v3335_v28 = vld [vmem:[#allocation5 + $0x4] ss:$16 sps:$4 sm:$0xff]   ;;  %v3339_v30 = vld [vmem:[#allocation5] ss:$16 sps:$4 sm:$0xff]  }
  0x4c   :  { %1355 = vmatpush1.bf16.msra.mxu1 %v3316_v15  ;;  %1315 = vmatprep.subr.bf16.mxu0 %v3317_v16  ;;  %v3337_v29 = vld [vmem:[#allocation5 + $0x204] ss:$16 sps:$4 sm:$0xff]   ;;  %v3340_v31 = vld [vmem:[#allocation5 + $0x200] ss:$16 sps:$4 sm:$0xff]   ;;  %v3395_v15 = vld [vmem:[#allocation5 + $0xec] ss:$16 sps:$4 sm:$0xff]  }
  0x4d   :  { %1356 = vmatprep.subr.bf16.mxu1 %v3319_v17  ;;  %v3341_v32 = vld [vmem:[#allocation5 + $0x1e4] ss:$16 sps:$4 sm:$0xff]   ;;  %v3345_v34 = vld [vmem:[#allocation5 + $0x1e0] ss:$16 sps:$4 sm:$0xff]  }
  0x4e   :  { %v3343_v33 = vld [vmem:[#allocation5 + $0x3e4] ss:$16 sps:$4 sm:$0xff]   ;;  %v3346_v35 = vld [vmem:[#allocation5 + $0x3e0] ss:$16 sps:$4 sm:$0xff]  }
  0x4f   :  { %1316 = vmatpush1.bf16.msra.mxu0 %v3321_v18  ;;  %v3347_v39 = vld [vmem:[#allocation5 + $0x1c4] ss:$16 sps:$4 sm:$0xff]   ;;  %v3351_v41 = vld [vmem:[#allocation5 + $0x1c0] ss:$16 sps:$4 sm:$0xff]  }
  0x50   :  { %1357 = vmatpush1.bf16.msra.mxu1 %v3322_v19  ;;  %1317 = vmatprep.subr.bf16.mxu0 %v3323_v20  ;;  %v3349_v40 = vld [vmem:[#allocation5 + $0x3c4] ss:$16 sps:$4 sm:$0xff]   ;;  %v3352_v44 = vld [vmem:[#allocation5 + $0x3c0] ss:$16 sps:$4 sm:$0xff]   ;;  %v3393_v19 = vld [vmem:[#allocation5 + $0xe8] ss:$16 sps:$4 sm:$0xff]  }
  0x51   :  { %1358 = vmatprep.subr.bf16.mxu1 %v3325_v21  ;;  %v3353_v45 = vld [vmem:[#allocation5 + $0x1a4] ss:$16 sps:$4 sm:$0xff]   ;;  %v3357_v47 = vld [vmem:[#allocation5 + $0x1a0] ss:$16 sps:$4 sm:$0xff]   ;;  %v3401_v21 = vld [vmem:[#allocation5 + $0xcc] ss:$16 sps:$4 sm:$0xff]  }
  0x52   :  { %v3355_v46 = vld [vmem:[#allocation5 + $0x3a4] ss:$16 sps:$4 sm:$0xff]   ;;  %v3358_v48 = vld [vmem:[#allocation5 + $0x3a0] ss:$16 sps:$4 sm:$0xff]  }
  0x53   :  { %1318 = vmatpush1.bf16.msra.mxu0 %v3327_v22  ;;  %v3359_v50 = vld [vmem:[#allocation5 + $0x184] ss:$16 sps:$4 sm:$0xff]   ;;  %v3363_v53 = vld [vmem:[#allocation5 + $0x180] ss:$16 sps:$4 sm:$0xff]  }
  0x54   :  { %1359 = vmatpush1.bf16.msra.mxu1 %v3328_v23  ;;  %1319 = vmatprep.subr.bf16.mxu0 %v3329_v24  ;;  %v3361_v51 = vld [vmem:[#allocation5 + $0x384] ss:$16 sps:$4 sm:$0xff]   ;;  %v3364_v56 = vld [vmem:[#allocation5 + $0x380] ss:$16 sps:$4 sm:$0xff]   ;;  %v3399_v23 = vld [vmem:[#allocation5 + $0xc8] ss:$16 sps:$4 sm:$0xff]  }
  0x55   :  { %1360 = vmatprep.subr.bf16.mxu1 %v3331_v25  ;;  %v92_v52 = vld [vmem:[#allocation2] sm:$0xff]  ;;  %v3369_v61 = vld [vmem:[#allocation5 + $0x160] ss:$16 sps:$4 sm:$0xff]   ;;  %v3407_v25 = vld [vmem:[#allocation5 + $0xac] ss:$16 sps:$4 sm:$0xff]  }
  0x56   :  { %v103_v54 = vrot.slane %v92_v52, %v102_v49  ;;  %v96_v55 = vcombine.high %v92_v52, %v92_v52  ;;  %v3365_v57 = vld [vmem:[#allocation5 + $0x164] ss:$16 sps:$4 sm:$0xff]   ;;  %v3370_v0 = vld [vmem:[#allocation5 + $0x360] ss:$16 sps:$4 sm:$0xff]  }
  0x57   :  { %1320 = vmatpush1.bf16.msra.mxu0 %v3333_v26  ;;  %v3367_v58 = vld [vmem:[#allocation5 + $0x364] ss:$16 sps:$4 sm:$0xff]   ;;  %v3375_v4 = vld [vmem:[#allocation5 + $0x140] ss:$16 sps:$4 sm:$0xff]  }
  0x58   :  { %1361 = vmatpush1.bf16.msra.mxu1 %v3334_v27  ;;  %1321 = vmatprep.subr.bf16.mxu0 %v3335_v28  ;;  %v111_v59 = vcombine.high %v103_v54, %v103_v54  ;;  %v110_v60 = vrot.slane %v96_v55, %v102_v49  ;;  %v3371_v1 = vld [vmem:[#allocation5 + $0x144] ss:$16 sps:$4 sm:$0xff]   ;;  %v3376_v5 = vld [vmem:[#allocation5 + $0x340] ss:$16 sps:$4 sm:$0xff]   ;;  %v4006_v16 = vpack.c.bf16 %v103_v54, %v103_v54  ;;  %v3405_v27 = vld [vmem:[#allocation5 + $0xa8] ss:$16 sps:$4 sm:$0xff]  }
  0x59   :  { %1362 = vmatprep.subr.bf16.mxu1 %v3337_v29  ;;  %v3373_v2 = vld [vmem:[#allocation5 + $0x344] ss:$16 sps:$4 sm:$0xff]   ;;  %v3381_v8 = vld [vmem:[#allocation5 + $0x120] ss:$16 sps:$4 sm:$0xff]   ;;  %v3413_v29 = vld [vmem:[#allocation5 + $0x8c] ss:$16 sps:$4 sm:$0xff]  }
  0x5a   :  { %v128_v62 = vpack.c.bf16 %v111_v59, %v111_v59  ;;  %v112_v63 = vcombine.high %v110_v60, %v110_v60  ;;  %v3377_v6 = vld [vmem:[#allocation5 + $0x124] ss:$16 sps:$4 sm:$0xff]   ;;  %v3382_v9 = vld [vmem:[#allocation5 + $0x320] ss:$16 sps:$4 sm:$0xff]   ;;  %v4008_v17 = vpack.c.bf16 %v110_v60, %v110_v60  ;;  %v3441_v55 = vld [vmem:[#allocation5 + $0x1e8] ss:$16 sps:$4 sm:$0xff]  }
  0x5b   :  { %1322 = vmatpush1.bf16.msra.mxu0 %v3339_v30  ;;  %v3379_v7 = vld [vmem:[#allocation5 + $0x324] ss:$16 sps:$4 sm:$0xff]   ;;  %v3387_v12 = vld [vmem:[#allocation5 + $0x100] ss:$16 sps:$4 sm:$0xff]   ;;  %v3447_v59 = vld [vmem:[#allocation5 + $0x1c8] ss:$16 sps:$4 sm:$0xff]  }
  0x5c   :  { %1363 = vmatpush1.bf16.msra.mxu1 %v3340_v31  ;;  %1323 = vmatprep.subr.bf16.mxu0 %v3341_v32  ;;  %v4003_v3 = vpack.c.bf16 %v112_v63, %v112_v63  ;;  %v3383_v10 = vld [vmem:[#allocation5 + $0x104] ss:$16 sps:$4 sm:$0xff]   ;;  %v3388_v13 = vld [vmem:[#allocation5 + $0x300] ss:$16 sps:$4 sm:$0xff]   ;;  %v3411_v31 = vld [vmem:[#allocation5 + $0x88] ss:$16 sps:$4 sm:$0xff]  }
  0x5d   :  { %1364 = vmatprep.subr.bf16.mxu1 %v3343_v33  ;;  %1339 = vmatprep.mubr.bf16.mxu0 %v128_v62  ;;  %v3385_v11 = vld [vmem:[#allocation5 + $0x304] ss:$16 sps:$4 sm:$0xff]   ;;  %v3390_v18 = vld [vmem:[#allocation5 + $0x4e0] ss:$16 sps:$4 sm:$0xff]   ;;  %v3419_v33 = vld [vmem:[#allocation5 + $0x6c] ss:$16 sps:$4 sm:$0xff]  }
  0x5e   :  { %1380 = vmatprep.mubr.bf16.mxu1 %v4003_v3  ;;  %v3392_v14 = vld [vmem:[#allocation5 + $0x4e4] ss:$16 sps:$4 sm:$0xff]   ;;  %v3396_v22 = vld [vmem:[#allocation5 + $0x4c0] ss:$16 sps:$4 sm:$0xff]   ;;  %v3453_v63 = vld [vmem:[#allocation5 + $0x1a8] ss:$16 sps:$4 sm:$0xff]  }
  0x5f   :  { %1324 = vmatpush2.bf16.msra.mxu0 %v3345_v34  ;;  %v3398_v20 = vld [vmem:[#allocation5 + $0x4c4] ss:$16 sps:$4 sm:$0xff]   ;;  %v3402_v26 = vld [vmem:[#allocation5 + $0x4a0] ss:$16 sps:$4 sm:$0xff]  }
  0x60   :  { %1365 = vmatpush2.bf16.msra.mxu1 %v3346_v35  ;;  %1325 = vmatprep.subr.bf16.mxu0 %v3347_v39  ;;  %v3404_v24 = vld [vmem:[#allocation5 + $0x4a4] ss:$16 sps:$4 sm:$0xff]   ;;  %v3408_v30 = vld [vmem:[#allocation5 + $0x480] ss:$16 sps:$4 sm:$0xff]   ;;  %v3417_v35 = vld [vmem:[#allocation5 + $0x68] ss:$16 sps:$4 sm:$0xff]  }
  0x61   :  { %1366 = vmatprep.subr.bf16.mxu1 %v3349_v40  ;;  %v3410_v28 = vld [vmem:[#allocation5 + $0x484] ss:$16 sps:$4 sm:$0xff]   ;;  %v3414_v34 = vld [vmem:[#allocation5 + $0x460] ss:$16 sps:$4 sm:$0xff]   ;;  %v3423_v39 = vld [vmem:[#allocation5 + $0x48] ss:$16 sps:$4 sm:$0xff]  }
  0x62   :  { %v3416_v32 = vld [vmem:[#allocation5 + $0x464] ss:$16 sps:$4 sm:$0xff]   ;;  %v3420_v38 = vld [vmem:[#allocation5 + $0x440] ss:$16 sps:$4 sm:$0xff]  }
  0x63   :  { %1326 = vmatpush2.bf16.msra.mxu0 %v3351_v41  ;;  %v3422_v36 = vld [vmem:[#allocation5 + $0x444] ss:$16 sps:$4 sm:$0xff]   ;;  %v3431_v41 = vld [vmem:[#allocation5 + $0x2c] ss:$16 sps:$4 sm:$0xff]   ;;  %v3438_v54 = vld [vmem:[#allocation5 + $0x5e0] ss:$16 sps:$4 sm:$0xff]  }
  0x64   :  { %1367 = vmatpush2.bf16.msra.mxu1 %v3352_v44  ;;  %1327 = vmatprep.subr.bf16.mxu0 %v3353_v45  ;;  %v3428_v40 = vld [vmem:[#allocation5 + $0x424] ss:$16 sps:$4 sm:$0xff]   ;;  %v4012_v42 = vld.sshfl [vmem:[#allocation2 + $0x8] sm:$0x33 pattern:$0x76325410] }
  0x65   :  { %1368 = vmatprep.subr.bf16.mxu1 %v3355_v46  ;;  %v120_v44 = vcombine.high %v4012_v42, %v4012_v42  ;;  %v3426_v45 = vld [vmem:[#allocation5 + $0x420] ss:$16 sps:$4 sm:$0xff]   ;;  %v3429_v46 = vld [vmem:[#allocation5 + $0x28] ss:$16 sps:$4 sm:$0xff]   ;;  %v3440_v52 = vld [vmem:[#allocation5 + $0x5e4] ss:$16 sps:$4 sm:$0xff]  }
  0x66   :  { %v3452_v60 = vld [vmem:[#allocation5 + $0x5a4] ss:$16 sps:$4 sm:$0xff]  }
  0x67   :  { %1328 = vmatpush2.bf16.msra.mxu0 %v3357_v47  ;;  %v3434_v47 = vld [vmem:[#allocation5 + $0x404] ss:$16 sps:$4 sm:$0xff]   ;;  %v4016_v49 = vpack.c.bf16 %v120_v44, %v120_v44  ;;  %v3521_v44 = vld [vmem:[#allocation5 + $0x44c] ss:$16 sps:$4 sm:$0xff]  }
  0x68   :  { %1369 = vmatpush2.bf16.msra.mxu1 %v3358_v48  ;;  %1329 = vmatprep.subr.bf16.mxu0 %v3359_v50  ;;  %v3437_v48 = vld [vmem:[#allocation5 + $0xc] ss:$16 sps:$4 sm:$0xff]   ;;  %v3432_v50 = vld [vmem:[#allocation5 + $0x400] ss:$16 sps:$4 sm:$0xff]  }
  0x69   :  { %1370 = vmatprep.subr.bf16.mxu1 %v3361_v51  ;;  %v3435_v51 = vld [vmem:[#allocation5 + $0x8] ss:$16 sps:$4 sm:$0xff]  }
  0x6b   :  { %1330 = vmatpush2.bf16.msra.mxu0 %v3363_v53  ;;  %v3443_v53 = vld [vmem:[#allocation5 + $0x1ec] ss:$16 sps:$4 sm:$0xff]  }
  0x6c   :  { %1371 = vmatpush2.bf16.msra.mxu1 %v3364_v56  ;;  %1331 = vmatprep.subr.bf16.mxu0 %v3365_v57  ;;  %v3446_v56 = vld [vmem:[#allocation5 + $0x5c4] ss:$16 sps:$4 sm:$0xff]   ;;  %v3449_v57 = vld [vmem:[#allocation5 + $0x1cc] ss:$16 sps:$4 sm:$0xff]  }
  0x6d   :  { %1372 = vmatprep.subr.bf16.mxu1 %v3367_v58  ;;  %v3444_v58 = vld [vmem:[#allocation5 + $0x5c0] ss:$16 sps:$4 sm:$0xff]  }
  0x6f   :  { %1332 = vmatpush2.bf16.msra.mxu0 %v3369_v61  ;;  %v3455_v61 = vld [vmem:[#allocation5 + $0x1ac] ss:$16 sps:$4 sm:$0xff]  }
  0x70   :  { %1373 = vmatpush2.bf16.msra.mxu1 %v3370_v0  ;;  %1333 = vmatprep.subr.bf16.mxu0 %v3371_v1  ;;  %v3458_v0 = vld [vmem:[#allocation5 + $0x584] ss:$16 sps:$4 sm:$0xff]   ;;  %v3461_v1 = vld [vmem:[#allocation5 + $0x18c] ss:$16 sps:$4 sm:$0xff]  }
  0x71   :  { %1374 = vmatprep.subr.bf16.mxu1 %v3373_v2  ;;  %v3456_v2 = vld [vmem:[#allocation5 + $0x580] ss:$16 sps:$4 sm:$0xff]  }
  0x73   :  { %1334 = vmatpush2.bf16.msra.mxu0 %v3375_v4  ;;  %v3459_v4 = vld [vmem:[#allocation5 + $0x188] ss:$16 sps:$4 sm:$0xff]  }
  0x74   :  { %1375 = vmatpush2.bf16.msra.mxu1 %v3376_v5  ;;  %1335 = vmatprep.subr.bf16.mxu0 %v3377_v6  ;;  %v3464_v5 = vld [vmem:[#allocation5 + $0x564] ss:$16 sps:$4 sm:$0xff]   ;;  %v3467_v6 = vld [vmem:[#allocation5 + $0x16c] ss:$16 sps:$4 sm:$0xff]  }
  0x75   :  { %1376 = vmatprep.subr.bf16.mxu1 %v3379_v7  ;;  %v3462_v7 = vld [vmem:[#allocation5 + $0x560] ss:$16 sps:$4 sm:$0xff]  }
  0x77   :  { %1336 = vmatpush2.bf16.msra.mxu0 %v3381_v8  ;;  %v3465_v8 = vld [vmem:[#allocation5 + $0x168] ss:$16 sps:$4 sm:$0xff]  }
  0x78   :  { %1377 = vmatpush2.bf16.msra.mxu1 %v3382_v9  ;;  %1337 = vmatprep.subr.bf16.mxu0 %v3383_v10  ;;  %v3470_v9 = vld [vmem:[#allocation5 + $0x544] ss:$16 sps:$4 sm:$0xff]   ;;  %v3473_v10 = vld [vmem:[#allocation5 + $0x14c] ss:$16 sps:$4 sm:$0xff]  }
  0x79   :  { %1378 = vmatprep.subr.bf16.mxu1 %v3385_v11  ;;  %v3468_v11 = vld [vmem:[#allocation5 + $0x540] ss:$16 sps:$4 sm:$0xff]  }
  0x7b   :  { %1338 = vmatpush2.bf16.msra.mxu0 %v3387_v12  ;;  %v3471_v12 = vld [vmem:[#allocation5 + $0x148] ss:$16 sps:$4 sm:$0xff]  }
  0x7c   :  { %1379 = vmatpush2.bf16.msra.mxu1 %v3388_v13  ;;  %1389 = vmatprep.subr.bf16.mxu0 %v3392_v14  ;;  %v3476_v13 = vld [vmem:[#allocation5 + $0x524] ss:$16 sps:$4 sm:$0xff]   ;;  %v3479_v14 = vld [vmem:[#allocation5 + $0x12c] ss:$16 sps:$4 sm:$0xff]  }
  0x7d   :  { %1430 = vmatprep.subr.bf16.mxu1 %v3395_v15  ;;  %v3474_v15 = vld [vmem:[#allocation5 + $0x520] ss:$16 sps:$4 sm:$0xff]  }
  0x7e   :  { %1340 = vmatmul.mubr.bf16.vlgmr.msra.gmra.mxu0 %v4006_v16 }
  0x7f   :  { %1381 = vmatmul.mubr.bf16.vlgmr.msra.gmra.mxu1 %v4008_v17  ;;  %1390 = vmatpush1.bf16.msra.mxu0 %v3390_v18  ;;  %v3477_v18 = vld [vmem:[#allocation5 + $0x128] ss:$16 sps:$4 sm:$0xff]  }
  0x80   :  { %1431 = vmatpush1.bf16.msra.mxu1 %v3393_v19  ;;  %1391 = vmatprep.subr.bf16.mxu0 %v3398_v20  ;;  %v3482_v19 = vld [vmem:[#allocation5 + $0x504] ss:$16 sps:$4 sm:$0xff]   ;;  %v3485_v20 = vld [vmem:[#allocation5 + $0x10c] ss:$16 sps:$4 sm:$0xff]  }
  0x81   :  { %1432 = vmatprep.subr.bf16.mxu1 %v3401_v21  ;;  %1462 = vmatprep.mubr.bf16.mxu1 %v128_v62  ;;  %v3450_v62 = vld [vmem:[#allocation5 + $0x5a0] ss:$16 sps:$4 sm:$0xff]  }
  0x82   :  { %1421 = vmatprep.mubr.bf16.mxu0 %v4016_v49  ;;  %v3480_v21 = vld [vmem:[#allocation5 + $0x500] ss:$16 sps:$4 sm:$0xff]  }
  0x83   :  { %1392 = vmatpush1.bf16.msra.mxu0 %v3396_v22  ;;  %v3483_v22 = vld [vmem:[#allocation5 + $0x108] ss:$16 sps:$4 sm:$0xff]  }
  0x84   :  { %1433 = vmatpush1.bf16.msra.mxu1 %v3399_v23  ;;  %1393 = vmatprep.subr.bf16.mxu0 %v3404_v24  ;;  %v3488_v23 = vld [vmem:[#allocation5 + $0x2ec] ss:$16 sps:$4 sm:$0xff]  }
  0x85   :  { %1434 = vmatprep.subr.bf16.mxu1 %v3407_v25  ;;  %v3491_v24 = vld [vmem:[#allocation5 + $0x4ec] ss:$16 sps:$4 sm:$0xff]   ;;  %v4021_v25 = vpack.c.bf16 %v4012_v42, %v4012_v42 }
  0x86   :  { %v3518_v42 = vld [vmem:[#allocation5 + $0x24c] ss:$16 sps:$4 sm:$0xff]  }
  0x87   :  { %1394 = vmatpush1.bf16.msra.mxu0 %v3402_v26  ;;  %v3486_v26 = vld [vmem:[#allocation5 + $0x2e8] ss:$16 sps:$4 sm:$0xff]  }
  0x88   :  { %1435 = vmatpush1.bf16.msra.mxu1 %v3405_v27  ;;  %1395 = vmatprep.subr.bf16.mxu0 %v3410_v28  ;;  %v3489_v27 = vld [vmem:[#allocation5 + $0x4e8] ss:$16 sps:$4 sm:$0xff]   ;;  %v3494_v28 = vld [vmem:[#allocation5 + $0x2cc] ss:$16 sps:$4 sm:$0xff]  }
  0x89   :  { %1436 = vmatprep.subr.bf16.mxu1 %v3413_v29  ;;  %v3497_v29 = vld [vmem:[#allocation5 + $0x4cc] ss:$16 sps:$4 sm:$0xff]  }
  0x8b   :  { %1396 = vmatpush1.bf16.msra.mxu0 %v3408_v30  ;;  %v3492_v30 = vld [vmem:[#allocation5 + $0x2c8] ss:$16 sps:$4 sm:$0xff]  }
  0x8c   :  { %1437 = vmatpush1.bf16.msra.mxu1 %v3411_v31  ;;  %1397 = vmatprep.subr.bf16.mxu0 %v3416_v32  ;;  %v3495_v31 = vld [vmem:[#allocation5 + $0x4c8] ss:$16 sps:$4 sm:$0xff]   ;;  %v3500_v32 = vld [vmem:[#allocation5 + $0x2ac] ss:$16 sps:$4 sm:$0xff]  }
  0x8d   :  { %1438 = vmatprep.subr.bf16.mxu1 %v3419_v33  ;;  %v3503_v33 = vld [vmem:[#allocation5 + $0x4ac] ss:$16 sps:$4 sm:$0xff]  }
  0x8f   :  { %1398 = vmatpush1.bf16.msra.mxu0 %v3414_v34  ;;  %v3498_v34 = vld [vmem:[#allocation5 + $0x2a8] ss:$16 sps:$4 sm:$0xff]  }
  0x90   :  { %1439 = vmatpush1.bf16.msra.mxu1 %v3417_v35  ;;  %1399 = vmatprep.subr.bf16.mxu0 %v3422_v36  ;;  %v3501_v35 = vld [vmem:[#allocation5 + $0x4a8] ss:$16 sps:$4 sm:$0xff]   ;;  %v3506_v36 = vld [vmem:[#allocation5 + $0x28c] ss:$16 sps:$4 sm:$0xff]  }
  0x91   :  { %1440 = vmatprep.subr.bf16.mxu1 %v3425_v37  ;;  %v3509_v37 = vld [vmem:[#allocation5 + $0x48c] ss:$16 sps:$4 sm:$0xff]  }
  0x93   :  { %1400 = vmatpush1.bf16.msra.mxu0 %v3420_v38  ;;  %v3507_v38 = vld [vmem:[#allocation5 + $0x488] ss:$16 sps:$4 sm:$0xff]  }
  0x94   :  { %1441 = vmatpush1.bf16.msra.mxu1 %v3423_v39  ;;  %1401 = vmatprep.subr.bf16.mxu0 %v3428_v40  ;;  %v3512_v39 = vld [vmem:[#allocation5 + $0x26c] ss:$16 sps:$4 sm:$0xff]  }
  0x95   :  { %1442 = vmatprep.subr.bf16.mxu1 %v3431_v41  ;;  %v3515_v40 = vld [vmem:[#allocation5 + $0x46c] ss:$16 sps:$4 sm:$0xff]   ;;  %v3510_v41 = vld [vmem:[#allocation5 + $0x268] ss:$16 sps:$4 sm:$0xff]  }
  0x97   :  { %1402 = vmatpush1.bf16.msra.mxu0 %v3426_v45  ;;  %v3516_v45 = vld [vmem:[#allocation5 + $0x248] ss:$16 sps:$4 sm:$0xff]  }
  0x98   :  { %1443 = vmatpush1.bf16.msra.mxu1 %v3429_v46  ;;  %1403 = vmatprep.subr.bf16.mxu0 %v3434_v47  ;;  %v3519_v46 = vld [vmem:[#allocation5 + $0x448] ss:$16 sps:$4 sm:$0xff]   ;;  %v3524_v47 = vld [vmem:[#allocation5 + $0x22c] ss:$16 sps:$4 sm:$0xff]  }
  0x99   :  { %1444 = vmatprep.subr.bf16.mxu1 %v3437_v48  ;;  %v3527_v48 = vld [vmem:[#allocation5 + $0x42c] ss:$16 sps:$4 sm:$0xff]  }
  0x9b   :  { %1404 = vmatpush1.bf16.msra.mxu0 %v3432_v50  ;;  %v3525_v50 = vld [vmem:[#allocation5 + $0x428] ss:$16 sps:$4 sm:$0xff]  }
  0x9c   :  { %1445 = vmatpush1.bf16.msra.mxu1 %v3435_v51  ;;  %1405 = vmatprep.subr.bf16.mxu0 %v3440_v52  ;;  %v3530_v51 = vld [vmem:[#allocation5 + $0x20c] ss:$16 sps:$4 sm:$0xff]  }
  0x9d   :  { %1446 = vmatprep.subr.bf16.mxu1 %v3443_v53  ;;  %v3533_v52 = vld [vmem:[#allocation5 + $0x40c] ss:$16 sps:$4 sm:$0xff]   ;;  %v3528_v53 = vld [vmem:[#allocation5 + $0x208] ss:$16 sps:$4 sm:$0xff]  }
  0x9f   :  { %1406 = vmatpush2.bf16.msra.mxu0 %v3438_v54  ;;  %v3531_v54 = vld [vmem:[#allocation5 + $0x408] ss:$16 sps:$4 sm:$0xff]  }
  0xa0   :  { %1447 = vmatpush2.bf16.msra.mxu1 %v3441_v55  ;;  %1407 = vmatprep.subr.bf16.mxu0 %v3446_v56  ;;  %v3536_v55 = vld [vmem:[#allocation5 + $0x3ec] ss:$16 sps:$4 sm:$0xff]  }
  0xa1   :  { %1448 = vmatprep.subr.bf16.mxu1 %v3449_v57  ;;  %v3539_v56 = vld [vmem:[#allocation5 + $0x5ec] ss:$16 sps:$4 sm:$0xff]   ;;  %v3534_v57 = vld [vmem:[#allocation5 + $0x3e8] ss:$16 sps:$4 sm:$0xff]  }
  0xa3   :  { %1408 = vmatpush2.bf16.msra.mxu0 %v3444_v58  ;;  %v3537_v58 = vld [vmem:[#allocation5 + $0x5e8] ss:$16 sps:$4 sm:$0xff]  }
  0xa4   :  { %1449 = vmatpush2.bf16.msra.mxu1 %v3447_v59  ;;  %1409 = vmatprep.subr.bf16.mxu0 %v3452_v60  ;;  %v3542_v59 = vld [vmem:[#allocation5 + $0x3cc] ss:$16 sps:$4 sm:$0xff]  }
  0xa5   :  { %1450 = vmatprep.subr.bf16.mxu1 %v3455_v61  ;;  %v3545_v60 = vld [vmem:[#allocation5 + $0x5cc] ss:$16 sps:$4 sm:$0xff]   ;;  %v3540_v61 = vld [vmem:[#allocation5 + $0x3c8] ss:$16 sps:$4 sm:$0xff]  }
  0xa7   :  { %1410 = vmatpush2.bf16.msra.mxu0 %v3450_v62  ;;  %v3543_v62 = vld [vmem:[#allocation5 + $0x5c8] ss:$16 sps:$4 sm:$0xff]  }
  0xa8   :  { %1451 = vmatpush2.bf16.msra.mxu1 %v3453_v63  ;;  %1411 = vmatprep.subr.bf16.mxu0 %v3458_v0  ;;  %v3548_v63 = vld [vmem:[#allocation5 + $0x3ac] ss:$16 sps:$4 sm:$0xff]  }
  0xa9   :  { %1452 = vmatprep.subr.bf16.mxu1 %v3461_v1  ;;  %v3551_v0 = vld [vmem:[#allocation5 + $0x5ac] ss:$16 sps:$4 sm:$0xff]   ;;  %v3546_v1 = vld [vmem:[#allocation5 + $0x3a8] ss:$16 sps:$4 sm:$0xff]  }
  0xab   :  { %1412 = vmatpush2.bf16.msra.mxu0 %v3456_v2  ;;  %v3549_v2 = vld [vmem:[#allocation5 + $0x5a8] ss:$16 sps:$4 sm:$0xff]  }
  0xac   :  { %1453 = vmatpush2.bf16.msra.mxu1 %v3459_v4  ;;  %1413 = vmatprep.subr.bf16.mxu0 %v3464_v5  ;;  %v3554_v4 = vld [vmem:[#allocation5 + $0x38c] ss:$16 sps:$4 sm:$0xff]  }
  0xad   :  { %1454 = vmatprep.subr.bf16.mxu1 %v3467_v6  ;;  %v3557_v5 = vld [vmem:[#allocation5 + $0x58c] ss:$16 sps:$4 sm:$0xff]   ;;  %v3552_v6 = vld [vmem:[#allocation5 + $0x388] ss:$16 sps:$4 sm:$0xff]  }
  0xaf   :  { %1414 = vmatpush2.bf16.msra.mxu0 %v3462_v7  ;;  %v3555_v7 = vld [vmem:[#allocation5 + $0x588] ss:$16 sps:$4 sm:$0xff]  }
  0xb0   :  { %1455 = vmatpush2.bf16.msra.mxu1 %v3465_v8  ;;  %1415 = vmatprep.subr.bf16.mxu0 %v3470_v9  ;;  %v3560_v8 = vld [vmem:[#allocation5 + $0x36c] ss:$16 sps:$4 sm:$0xff]  }
  0xb1   :  { %1456 = vmatprep.subr.bf16.mxu1 %v3473_v10  ;;  %v3563_v9 = vld [vmem:[#allocation5 + $0x56c] ss:$16 sps:$4 sm:$0xff]   ;;  %v3558_v10 = vld [vmem:[#allocation5 + $0x368] ss:$16 sps:$4 sm:$0xff]  }
  0xb3   :  { %1416 = vmatpush2.bf16.msra.mxu0 %v3468_v11  ;;  %v3561_v11 = vld [vmem:[#allocation5 + $0x568] ss:$16 sps:$4 sm:$0xff]  }
  0xb4   :  { %1457 = vmatpush2.bf16.msra.mxu1 %v3471_v12  ;;  %1417 = vmatprep.subr.bf16.mxu0 %v3476_v13  ;;  %v3566_v12 = vld [vmem:[#allocation5 + $0x34c] ss:$16 sps:$4 sm:$0xff]  }
  0xb5   :  { %1458 = vmatprep.subr.bf16.mxu1 %v3479_v14  ;;  %v3569_v13 = vld [vmem:[#allocation5 + $0x54c] ss:$16 sps:$4 sm:$0xff]   ;;  %v3564_v14 = vld [vmem:[#allocation5 + $0x348] ss:$16 sps:$4 sm:$0xff]  }
  0xb7   :  { %1418 = vmatpush2.bf16.msra.mxu0 %v3474_v15  ;;  %v3567_v15 = vld [vmem:[#allocation5 + $0x548] ss:$16 sps:$4 sm:$0xff]  }
  0xb8   :  { %1459 = vmatpush2.bf16.msra.mxu1 %v3477_v18  ;;  %1419 = vmatprep.subr.bf16.mxu0 %v3482_v19  ;;  %v3572_v18 = vld [vmem:[#allocation5 + $0x32c] ss:$16 sps:$4 sm:$0xff]  }
  0xb9   :  { %1460 = vmatprep.subr.bf16.mxu1 %v3485_v20  ;;  %v3575_v19 = vld [vmem:[#allocation5 + $0x52c] ss:$16 sps:$4 sm:$0xff]   ;;  %v3570_v20 = vld [vmem:[#allocation5 + $0x328] ss:$16 sps:$4 sm:$0xff]  }
  0xbb   :  { %1420 = vmatpush2.bf16.msra.mxu0 %v3480_v21  ;;  %v3573_v21 = vld [vmem:[#allocation5 + $0x528] ss:$16 sps:$4 sm:$0xff]  }
  0xbc   :  { %1461 = vmatpush2.bf16.msra.mxu1 %v3483_v22  ;;  %1471 = vmatprep.subr.bf16.mxu0 %v3488_v23  ;;  %v3578_v22 = vld [vmem:[#allocation5 + $0x30c] ss:$16 sps:$4 sm:$0xff]  }
  0xbd   :  { %1512 = vmatprep.subr.bf16.mxu1 %v3491_v24  ;;  %v3581_v23 = vld [vmem:[#allocation5 + $0x50c] ss:$16 sps:$4 sm:$0xff]   ;;  %v3576_v24 = vld [vmem:[#allocation5 + $0x308] ss:$16 sps:$4 sm:$0xff]  }
  0xbe   :  { %1422 = vmatmul.mubr.bf16.vlgmr.msra.gmra.mxu0 %v4021_v25 }
  0xbf   :  { %1463 = vmatmul.mubr.bf16.vlgmr.msra.gmra.mxu1 %v4006_v16  ;;  %1472 = vmatpush1.bf16.msra.mxu0 %v3486_v26  ;;  %v3504_v16 = vld [vmem:[#allocation5 + $0x288] ss:$16 sps:$4 sm:$0xff]  }
  0xc0   :  { %1513 = vmatpush1.bf16.msra.mxu1 %v3489_v27  ;;  %1473 = vmatprep.subr.bf16.mxu0 %v3494_v28  ;;  %v3579_v26 = vld [vmem:[#allocation5 + $0x508] ss:$16 sps:$4 sm:$0xff]   ;;  %v3582_v28 = vld [vmem:[#allocation8 + $0xe0] ss:$16 sps:$4 sm:$0xff]  }
  0xc1   :  { %1514 = vmatprep.subr.bf16.mxu1 %v3497_v29  ;;  %1503 = vmatprep.mubr.bf16.mxu0 %v4003_v3  ;;  %v3513_v3 = vld [vmem:[#allocation5 + $0x468] ss:$16 sps:$4 sm:$0xff]  }
  0xc2   :  { %1544 = vmatprep.mubr.bf16.mxu1 %v4016_v49  ;;  %v3522_v49 = vld [vmem:[#allocation5 + $0x228] ss:$16 sps:$4 sm:$0xff]  }
  0xc3   :  { %1474 = vmatpush1.bf16.msra.mxu0 %v3492_v30  ;;  %v3584_v27 = vld [vmem:[#allocation8 + $0xe4] ss:$16 sps:$4 sm:$0xff]   ;;  %v3585_v30 = vld [vmem:[#allocation8 + $0xc0] ss:$16 sps:$4 sm:$0xff]  }
  0xc4   :  { %1515 = vmatpush1.bf16.msra.mxu1 %v3495_v31  ;;  %1475 = vmatprep.subr.bf16.mxu0 %v3500_v32  ;;  %v3587_v29 = vld [vmem:[#allocation8 + $0xc4] ss:$16 sps:$4 sm:$0xff]   ;;  %v3588_v32 = vld [vmem:[#allocation8 + $0xa0] ss:$16 sps:$4 sm:$0xff]  }
  0xc5   :  { %1516 = vmatprep.subr.bf16.mxu1 %v3503_v33  ;;  %v3590_v31 = vld [vmem:[#allocation8 + $0xa4] ss:$16 sps:$4 sm:$0xff]  }
  0xc6   :  { %v3593_v33 = vld [vmem:[#allocation8 + $0x84] ss:$16 sps:$4 sm:$0xff]  }
  0xc7   :  { %1476 = vmatpush1.bf16.msra.mxu0 %v3498_v34  ;;  %v3591_v34 = vld [vmem:[#allocation8 + $0x80] ss:$16 sps:$4 sm:$0xff]  }
  0xc8   :  { %1517 = vmatpush1.bf16.msra.mxu1 %v3501_v35  ;;  %1477 = vmatprep.subr.bf16.mxu0 %v3506_v36  ;;  %v3596_v35 = vld [vmem:[#allocation8 + $0x64] ss:$16 sps:$4 sm:$0xff]  }
  0xc9   :  { %1518 = vmatprep.subr.bf16.mxu1 %v3509_v37  ;;  %v3635_v36 = vld [vmem:[#allocation8 + $0x2e4] ss:$16 sps:$4 sm:$0xff]   ;;  %v3633_v37 = vld [vmem:[#allocation8 + $0x2e0] ss:$16 sps:$4 sm:$0xff]  }
  0xcb   :  { %1478 = vmatpush1.bf16.msra.mxu0 %v3504_v16  ;;  %v3594_v16 = vld [vmem:[#allocation8 + $0x60] ss:$16 sps:$4 sm:$0xff]  }
  0xcc   :  { %1519 = vmatpush1.bf16.msra.mxu1 %v3507_v38  ;;  %1479 = vmatprep.subr.bf16.mxu0 %v3512_v39  ;;  %v3639_v38 = vld [vmem:[#allocation8 + $0x2c0] ss:$16 sps:$4 sm:$0xff]  }
  0xcd   :  { %1520 = vmatprep.subr.bf16.mxu1 %v3515_v40  ;;  %v3597_v39 = vld [vmem:[#allocation8 + $0x40] ss:$16 sps:$4 sm:$0xff]   ;;  %v3602_v40 = vld [vmem:[#allocation8 + $0x24] ss:$16 sps:$4 sm:$0xff]  }
  0xcf   :  { %1480 = vmatpush1.bf16.msra.mxu0 %v3510_v41  ;;  %v3647_v41 = vld [vmem:[#allocation8 + $0x2a4] ss:$16 sps:$4 sm:$0xff]  }
  0xd0   :  { %1521 = vmatpush1.bf16.msra.mxu1 %v3513_v3  ;;  %1481 = vmatprep.subr.bf16.mxu0 %v3518_v42  ;;  %v3645_v3 = vld [vmem:[#allocation8 + $0x2a0] ss:$16 sps:$4 sm:$0xff]  }
  0xd1   :  { %1522 = vmatprep.subr.bf16.mxu1 %v3521_v44  ;;  %v3600_v42 = vld [vmem:[#allocation8 + $0x20] ss:$16 sps:$4 sm:$0xff]   ;;  %v3605_v44 = vld [vmem:[#allocation8 + $0x4] ss:$16 sps:$4 sm:$0xff]  }
  0xd3   :  { %1482 = vmatpush1.bf16.msra.mxu0 %v3516_v45  ;;  %v3653_v45 = vld [vmem:[#allocation8 + $0x284] ss:$16 sps:$4 sm:$0xff]  }
  0xd4   :  { %1523 = vmatpush1.bf16.msra.mxu1 %v3519_v46  ;;  %1483 = vmatprep.subr.bf16.mxu0 %v3524_v47  ;;  %v3651_v46 = vld [vmem:[#allocation8 + $0x280] ss:$16 sps:$4 sm:$0xff]  }
  0xd5   :  { %1524 = vmatprep.subr.bf16.mxu1 %v3527_v48  ;;  %v3603_v47 = vld [vmem:[#allocation8] ss:$16 sps:$4 sm:$0xff]   ;;  %v3608_v48 = vld [vmem:[#allocation8 + $0x1e4] ss:$16 sps:$4 sm:$0xff]  }
  0xd7   :  { %1484 = vmatpush1.bf16.msra.mxu0 %v3522_v49  ;;  %v3659_v49 = vld [vmem:[#allocation8 + $0x264] ss:$16 sps:$4 sm:$0xff]  }
  0xd8   :  { %1525 = vmatpush1.bf16.msra.mxu1 %v3525_v50  ;;  %1485 = vmatprep.subr.bf16.mxu0 %v3530_v51  ;;  %v3657_v50 = vld [vmem:[#allocation8 + $0x260] ss:$16 sps:$4 sm:$0xff]  }
  0xd9   :  { %1526 = vmatprep.subr.bf16.mxu1 %v3533_v52  ;;  %v3606_v51 = vld [vmem:[#allocation8 + $0x1e0] ss:$16 sps:$4 sm:$0xff]   ;;  %v3611_v52 = vld [vmem:[#allocation8 + $0x1c4] ss:$16 sps:$4 sm:$0xff]  }
  0xdb   :  { %1486 = vmatpush1.bf16.msra.mxu0 %v3528_v53  ;;  %v3665_v53 = vld [vmem:[#allocation8 + $0x244] ss:$16 sps:$4 sm:$0xff]  }
  0xdc   :  { %1527 = vmatpush1.bf16.msra.mxu1 %v3531_v54  ;;  %1487 = vmatprep.subr.bf16.mxu0 %v3536_v55  ;;  %v3663_v54 = vld [vmem:[#allocation8 + $0x240] ss:$16 sps:$4 sm:$0xff]  }
  0xdd   :  { %1528 = vmatprep.subr.bf16.mxu1 %v3539_v56  ;;  %v3609_v55 = vld [vmem:[#allocation8 + $0x1c0] ss:$16 sps:$4 sm:$0xff]   ;;  %v3614_v56 = vld [vmem:[#allocation8 + $0x1a4] ss:$16 sps:$4 sm:$0xff]  }
  0xdf   :  { %1488 = vmatpush2.bf16.msra.mxu0 %v3534_v57  ;;  %v3671_v57 = vld [vmem:[#allocation8 + $0x224] ss:$16 sps:$4 sm:$0xff]  }
  0xe0   :  { %1529 = vmatpush2.bf16.msra.mxu1 %v3537_v58  ;;  %1489 = vmatprep.subr.bf16.mxu0 %v3542_v59  ;;  %v3669_v58 = vld [vmem:[#allocation8 + $0x220] ss:$16 sps:$4 sm:$0xff]  }
  0xe1   :  { %1530 = vmatprep.subr.bf16.mxu1 %v3545_v60  ;;  %v3612_v59 = vld [vmem:[#allocation8 + $0x1a0] ss:$16 sps:$4 sm:$0xff]   ;;  %v3617_v60 = vld [vmem:[#allocation8 + $0x184] ss:$16 sps:$4 sm:$0xff]  }
  0xe3   :  { %1490 = vmatpush2.bf16.msra.mxu0 %v3540_v61  ;;  %v3677_v61 = vld [vmem:[#allocation8 + $0x204] ss:$16 sps:$4 sm:$0xff]  }
  0xe4   :  { %1531 = vmatpush2.bf16.msra.mxu1 %v3543_v62  ;;  %1491 = vmatprep.subr.bf16.mxu0 %v3548_v63  ;;  %v3675_v62 = vld [vmem:[#allocation8 + $0x200] ss:$16 sps:$4 sm:$0xff]  }
  0xe5   :  { %1532 = vmatprep.subr.bf16.mxu1 %v3551_v0  ;;  %v3615_v63 = vld [vmem:[#allocation8 + $0x180] ss:$16 sps:$4 sm:$0xff]   ;;  %v3620_v0 = vld [vmem:[#allocation8 + $0x164] ss:$16 sps:$4 sm:$0xff]  }
  0xe7   :  { %1492 = vmatpush2.bf16.msra.mxu0 %v3546_v1  ;;  %v3683_v1 = vld [vmem:[#allocation8 + $0x3e4] ss:$16 sps:$4 sm:$0xff]  }
  0xe8   :  { %1533 = vmatpush2.bf16.msra.mxu1 %v3549_v2  ;;  %1493 = vmatprep.subr.bf16.mxu0 %v3554_v4  ;;  %v3681_v2 = vld [vmem:[#allocation8 + $0x3e0] ss:$16 sps:$4 sm:$0xff]  }
  0xe9   :  { %1534 = vmatprep.subr.bf16.mxu1 %v3557_v5  ;;  %v3618_v4 = vld [vmem:[#allocation8 + $0x160] ss:$16 sps:$4 sm:$0xff]   ;;  %v3623_v5 = vld [vmem:[#allocation8 + $0x144] ss:$16 sps:$4 sm:$0xff]  }
  0xeb   :  { %1494 = vmatpush2.bf16.msra.mxu0 %v3552_v6  ;;  %v3689_v6 = vld [vmem:[#allocation8 + $0x3c4] ss:$16 sps:$4 sm:$0xff]  }
  0xec   :  { %1535 = vmatpush2.bf16.msra.mxu1 %v3555_v7  ;;  %1495 = vmatprep.subr.bf16.mxu0 %v3560_v8  ;;  %v3687_v7 = vld [vmem:[#allocation8 + $0x3c0] ss:$16 sps:$4 sm:$0xff]  }
  0xed   :  { %1536 = vmatprep.subr.bf16.mxu1 %v3563_v9  ;;  %v3621_v8 = vld [vmem:[#allocation8 + $0x140] ss:$16 sps:$4 sm:$0xff]   ;;  %v3626_v9 = vld [vmem:[#allocation8 + $0x124] ss:$16 sps:$4 sm:$0xff]  }
  0xef   :  { %1496 = vmatpush2.bf16.msra.mxu0 %v3558_v10  ;;  %v3695_v10 = vld [vmem:[#allocation8 + $0x3a4] ss:$16 sps:$4 sm:$0xff]  }
  0xf0   :  { %1537 = vmatpush2.bf16.msra.mxu1 %v3561_v11  ;;  %1497 = vmatprep.subr.bf16.mxu0 %v3566_v12  ;;  %v3693_v11 = vld [vmem:[#allocation8 + $0x3a0] ss:$16 sps:$4 sm:$0xff]  }
  0xf1   :  { %1538 = vmatprep.subr.bf16.mxu1 %v3569_v13  ;;  %v3624_v12 = vld [vmem:[#allocation8 + $0x120] ss:$16 sps:$4 sm:$0xff]   ;;  %v3629_v13 = vld [vmem:[#allocation8 + $0x104] ss:$16 sps:$4 sm:$0xff]  }
  0xf3   :  { %1498 = vmatpush2.bf16.msra.mxu0 %v3564_v14  ;;  %v3701_v14 = vld [vmem:[#allocation8 + $0x384] ss:$16 sps:$4 sm:$0xff]  }
  0xf4   :  { %1539 = vmatpush2.bf16.msra.mxu1 %v3567_v15  ;;  %1499 = vmatprep.subr.bf16.mxu0 %v3572_v18  ;;  %v3699_v15 = vld [vmem:[#allocation8 + $0x380] ss:$16 sps:$4 sm:$0xff]  }
  0xf5   :  { %1540 = vmatprep.subr.bf16.mxu1 %v3575_v19  ;;  %v3627_v18 = vld [vmem:[#allocation8 + $0x100] ss:$16 sps:$4 sm:$0xff]   ;;  %v3632_v19 = vld [vmem:[#allocation8 + $0xec] ss:$16 sps:$4 sm:$0xff]  }
  0xf7   :  { %1500 = vmatpush2.bf16.msra.mxu0 %v3570_v20  ;;  %v3707_v20 = vld [vmem:[#allocation8 + $0x364] ss:$16 sps:$4 sm:$0xff]  }
  0xf8   :  { %1541 = vmatpush2.bf16.msra.mxu1 %v3573_v21  ;;  %1501 = vmatprep.subr.bf16.mxu0 %v3578_v22  ;;  %v3705_v21 = vld [vmem:[#allocation8 + $0x360] ss:$16 sps:$4 sm:$0xff]   ;;  %v3713_v22 = vld [vmem:[#allocation8 + $0x344] ss:$16 sps:$4 sm:$0xff]  }
  0xf9   :  { %1542 = vmatprep.subr.bf16.mxu1 %v3581_v23  ;;  %v3711_v23 = vld [vmem:[#allocation8 + $0x340] ss:$16 sps:$4 sm:$0xff]  }
  0xfb   :  { %1502 = vmatpush2.bf16.msra.mxu0 %v3576_v24 }
  0xfc   :  { %1543 = vmatpush2.bf16.msra.mxu1 %v3579_v26  ;;  %2351 = vmatprep.subr.bf16.mxu0 %v3584_v27 }
  0xfd   :  { %2392 = vmatprep.subr.bf16.mxu1 %v3635_v36  ;;  %v3723_v36 = vld [vmem:[#allocation8 + $0x300] ss:$16 sps:$4 sm:$0xff]  }
  0xfe   :  { %1504 = vmatmul.mubr.bf16.vlgmr.msra.gmra.mxu0 %v4008_v17  ;;  %v3599_v17 = vld [vmem:[#allocation8 + $0x44] ss:$16 sps:$4 sm:$0xff]  }
  0xff   :  { %1545 = vmatmul.mubr.bf16.vlgmr.msra.gmra.mxu1 %v4021_v25  ;;  %2352 = vmatpush1.bf16.msra.mxu0 %v3582_v28  ;;  %v3641_v25 = vld [vmem:[#allocation8 + $0x2c4] ss:$16 sps:$4 sm:$0xff]  }
 0x100   :  { %2353 = vmatprep.subr.bf16.mxu0 %v3587_v29  ;;  %2393 = vmatpush1.bf16.msra.mxu1 %v3633_v37  ;;  %v3719_v29 = vld [vmem:[#allocation8 + $0x324] ss:$16 sps:$4 sm:$0xff]   ;;  %v3728_v37 = vld [vmem:[#allocation8 + $0x2ec] ss:$16 sps:$4 sm:$0xff]  }
 0x101   :  { %2394 = vmatprep.subr.bf16.mxu1 %v3641_v25  ;;  %v333_v25 = vsub.s32 1, %v4000_v43 }
 0x103   :  { %2354 = vmatpush1.bf16.msra.mxu0 %v3585_v30  ;;  %v3717_v30 = vld [vmem:[#allocation8 + $0x320] ss:$16 sps:$4 sm:$0xff]  }
 0x104   :  { %2355 = vmatprep.subr.bf16.mxu0 %v3590_v31  ;;  %2395 = vmatpush1.bf16.msra.mxu1 %v3639_v38 }
 0x105   :  { %2396 = vmatprep.subr.bf16.mxu1 %v3647_v41 }
 0x107   :  { %2356 = vmatpush1.bf16.msra.mxu0 %v3588_v32 }
 0x108   :  { %2357 = vmatprep.subr.bf16.mxu0 %v3593_v33  ;;  %2397 = vmatpush1.bf16.msra.mxu1 %v3645_v3 }
 0x109   :  { %2398 = vmatprep.subr.bf16.mxu1 %v3653_v45 }
 0x10b   :  { %2358 = vmatpush1.bf16.msra.mxu0 %v3591_v34 }
 0x10c   :  { %2359 = vmatprep.subr.bf16.mxu0 %v3596_v35  ;;  %2399 = vmatpush1.bf16.msra.mxu1 %v3651_v46  ;;  %v3725_v35 = vld [vmem:[#allocation8 + $0x304] ss:$16 sps:$4 sm:$0xff]  }
 0x10d   :  { %2400 = vmatprep.subr.bf16.mxu1 %v3659_v49 }
 0x10f   :  { %2360 = vmatpush1.bf16.msra.mxu0 %v3594_v16  ;;  %v329_v16 = vsub.s32 0, %v4000_v43 }
 0x110   :  { %2361 = vmatprep.subr.bf16.mxu0 %v3599_v17  ;;  %2401 = vmatpush1.bf16.msra.mxu1 %v3657_v50  ;;  %v4030_v17 = vld [vmem:[#allocation7] sm:$0xf] }
 0x111   :  { %2402 = vmatprep.subr.bf16.mxu1 %v3665_v53  ;;  %v330_v38 = vrot.slane %v4030_v17, %v329_v16 }
 0x113   :  { %2362 = vmatpush1.bf16.msra.mxu0 %v3597_v39  ;;  %v334_v39 = vrot.slane %v4030_v17, %v333_v25 }
 0x114   :  { %2363 = vmatprep.subr.bf16.mxu0 %v3602_v40  ;;  %2403 = vmatpush1.bf16.msra.mxu1 %v3663_v54 }
 0x115   :  { %2404 = vmatprep.subr.bf16.mxu1 %v3671_v57  ;;  %v3630_v57 = vld [vmem:[#allocation8 + $0xe8] ss:$16 sps:$4 sm:$0xff]  }
 0x117   :  { %2364 = vmatpush1.bf16.msra.mxu0 %v3600_v42 }
 0x118   :  { %2365 = vmatprep.subr.bf16.mxu0 %v3605_v44  ;;  %2405 = vmatpush1.bf16.msra.mxu1 %v3669_v58 }
 0x119   :  { %2406 = vmatprep.subr.bf16.mxu1 %v3677_v61  ;;  %v3644_v61 = vld [vmem:[#allocation8 + $0xac] ss:$16 sps:$4 sm:$0xff]  }
 0x11b   :  { %2366 = vmatpush1.bf16.msra.mxu0 %v3603_v47 }
 0x11c   :  { %2367 = vmatprep.subr.bf16.mxu0 %v3608_v48  ;;  %2407 = vmatpush1.bf16.msra.mxu1 %v3675_v62  ;;  %v3642_v62 = vld [vmem:[#allocation8 + $0xa8] ss:$16 sps:$4 sm:$0xff]  }
 0x11d   :  { %2408 = vmatprep.subr.bf16.mxu1 %v3683_v1  ;;  %v3656_v1 = vld [vmem:[#allocation8 + $0x6c] ss:$16 sps:$4 sm:$0xff]  }
 0x11f   :  { %2368 = vmatpush2.bf16.msra.mxu0 %v3606_v51 }
 0x120   :  { %2369 = vmatprep.subr.bf16.mxu0 %v3611_v52  ;;  %2409 = vmatpush2.bf16.msra.mxu1 %v3681_v2  ;;  %v3654_v2 = vld [vmem:[#allocation8 + $0x68] ss:$16 sps:$4 sm:$0xff]  }
 0x121   :  { %2410 = vmatprep.subr.bf16.mxu1 %v3689_v6  ;;  %v3668_v6 = vld [vmem:[#allocation8 + $0x2c] ss:$16 sps:$4 sm:$0xff]  }
 0x123   :  { %2370 = vmatpush2.bf16.msra.mxu0 %v3609_v55 }
 0x124   :  { %2371 = vmatprep.subr.bf16.mxu0 %v3614_v56  ;;  %2411 = vmatpush2.bf16.msra.mxu1 %v3687_v7  ;;  %v3666_v7 = vld [vmem:[#allocation8 + $0x28] ss:$16 sps:$4 sm:$0xff]  }
 0x125   :  { %2412 = vmatprep.subr.bf16.mxu1 %v3695_v10  ;;  %v3680_v10 = vld [vmem:[#allocation8 + $0x1ec] ss:$16 sps:$4 sm:$0xff]  }
 0x127   :  { %2372 = vmatpush2.bf16.msra.mxu0 %v3612_v59  ;;  %v3638_v59 = vld [vmem:[#allocation8 + $0xcc] ss:$16 sps:$4 sm:$0xff]  }
 0x128   :  { %2373 = vmatprep.subr.bf16.mxu0 %v3617_v60  ;;  %2413 = vmatpush2.bf16.msra.mxu1 %v3693_v11  ;;  %v3636_v60 = vld [vmem:[#allocation8 + $0xc8] ss:$16 sps:$4 sm:$0xff]  }
 0x129   :  { %2414 = vmatprep.subr.bf16.mxu1 %v3701_v14  ;;  %v3678_v11 = vld [vmem:[#allocation8 + $0x1e8] ss:$16 sps:$4 sm:$0xff]   ;;  %v3692_v14 = vld [vmem:[#allocation8 + $0x1ac] ss:$16 sps:$4 sm:$0xff]  }
 0x12b   :  { %2374 = vmatpush2.bf16.msra.mxu0 %v3615_v63  ;;  %v3650_v63 = vld [vmem:[#allocation8 + $0x8c] ss:$16 sps:$4 sm:$0xff]  }
 0x12c   :  { %2375 = vmatprep.subr.bf16.mxu0 %v3620_v0  ;;  %2415 = vmatpush2.bf16.msra.mxu1 %v3699_v15  ;;  %v3648_v0 = vld [vmem:[#allocation8 + $0x88] ss:$16 sps:$4 sm:$0xff]  }
 0x12d   :  { %2416 = vmatprep.subr.bf16.mxu1 %v3707_v20  ;;  %v3690_v15 = vld [vmem:[#allocation8 + $0x1a8] ss:$16 sps:$4 sm:$0xff]   ;;  %v3704_v20 = vld [vmem:[#allocation8 + $0x16c] ss:$16 sps:$4 sm:$0xff]  }
 0x12f   :  { %2376 = vmatpush2.bf16.msra.mxu0 %v3618_v4  ;;  %v3662_v4 = vld [vmem:[#allocation8 + $0x4c] ss:$16 sps:$4 sm:$0xff]  }
 0x130   :  { %2377 = vmatprep.subr.bf16.mxu0 %v3623_v5  ;;  %2417 = vmatpush2.bf16.msra.mxu1 %v3705_v21  ;;  %v3660_v5 = vld [vmem:[#allocation8 + $0x48] ss:$16 sps:$4 sm:$0xff]   ;;  %v337_v21 = vsub.s32 2, %v4000_v43 }
 0x131   :  { %2418 = vmatprep.subr.bf16.mxu1 %v3713_v22  ;;  %v3702_v22 = vld [vmem:[#allocation8 + $0x168] ss:$16 sps:$4 sm:$0xff]  }
 0x133   :  { %2378 = vmatpush2.bf16.msra.mxu0 %v3621_v8  ;;  %v3674_v8 = vld [vmem:[#allocation8 + $0xc] ss:$16 sps:$4 sm:$0xff]  }
 0x134   :  { %2379 = vmatprep.subr.bf16.mxu0 %v3626_v9  ;;  %2419 = vmatpush2.bf16.msra.mxu1 %v3711_v23  ;;  %v3672_v9 = vld [vmem:[#allocation8 + $0x8] ss:$16 sps:$4 sm:$0xff]   ;;  %v3710_v23 = vld [vmem:[#allocation8 + $0x14c] ss:$16 sps:$4 sm:$0xff]  }
 0x135   :  { %2420 = vmatprep.subr.bf16.mxu1 %v3719_v29 }
 0x137   :  { %2380 = vmatpush2.bf16.msra.mxu0 %v3624_v12  ;;  %v3686_v12 = vld [vmem:[#allocation8 + $0x1cc] ss:$16 sps:$4 sm:$0xff]  }
 0x138   :  { %2381 = vmatprep.subr.bf16.mxu0 %v3629_v13  ;;  %2421 = vmatpush2.bf16.msra.mxu1 %v3717_v30  ;;  %v3684_v13 = vld [vmem:[#allocation8 + $0x1c8] ss:$16 sps:$4 sm:$0xff]  }
 0x139   :  { %2422 = vmatprep.subr.bf16.mxu1 %v3725_v35 }
 0x13b   :  { %2382 = vmatpush2.bf16.msra.mxu0 %v3627_v18  ;;  %v3698_v18 = vld [vmem:[#allocation8 + $0x18c] ss:$16 sps:$4 sm:$0xff]  }
 0x13c   :  { %2433 = vmatprep.subr.bf16.mxu0 %v3632_v19  ;;  %2423 = vmatpush2.bf16.msra.mxu1 %v3723_v36  ;;  %v3696_v19 = vld [vmem:[#allocation8 + $0x188] ss:$16 sps:$4 sm:$0xff]  }
 0x13d   :  { %2474 = vmatprep.subr.bf16.mxu1 %v3728_v37 }
 0x13e   :  { %v1341_v24 = vpop.f32.mrf.mxu0 }
 0x13f   :  { %v1382_v26 = vpop.f32.mrf.mxu1  ;;  %v1342_v40 = vadd.f32 %v1341_v24, %v330_v38  ;;  %v341_v24 = vsub.s32 3, %v4000_v43 }
 0x140   :  { %v1343_v27 = vpop.f32.mrf.mxu0 }
 0x141   :  { %v1384_v28 = vpop.f32.mrf.mxu1  ;;  %v1344_v41 = vadd.f32 %v1343_v27, %v334_v39  ;;  %v1383_v3 = vadd.f32 %v1382_v26, %v1342_v40  ;;  %v338_v26 = vrot.slane %v4030_v17, %v337_v21  ;;  %v3708_v27 = vld [vmem:[#allocation8 + $0x148] ss:$16 sps:$4 sm:$0xff]   ;;  %v342_v29 = vrot.slane %v4030_v17, %v341_v24 }
 0x142   :  { %v1345_v31 = vpop.f32.mrf.mxu0 }
 0x143   :  { %v1386_v32 = vpop.f32.mrf.mxu1  ;;  %v1385_v45 = vadd.f32 %v1384_v28, %v1344_v41  ;;  %v3716_v28 = vld [vmem:[#allocation8 + $0x12c] ss:$16 sps:$4 sm:$0xff]   ;;  %v3714_v31 = vld [vmem:[#allocation8 + $0x128] ss:$16 sps:$4 sm:$0xff]  }
 0x144   :  { %v1346_v33 = vpop.f32.mrf.mxu0  ;;  %v3720_v41 = vld [vmem:[#allocation8 + $0x108] ss:$16 sps:$4 sm:$0xff]  }
 0x145   :  { %v1387_v34 = vpop.f32.mrf.mxu1 }
 0x146   :  { %v3722_v34 = vld [vmem:[#allocation8 + $0x10c] ss:$16 sps:$4 sm:$0xff]  }
 0x17e   :  { %v1423_v42 = vpop.f32.mrf.mxu0 }
 0x17f   :  { %v4039_v44 = vpop.f32.mrf.mxu1  ;;  %v1424_v46 = vadd.f32 %v1423_v42, %v1383_v3 }
 0x180   :  { %v1425_v47 = vpop.f32.mrf.mxu0  ;;  %v1465_v30 = vadd.f32 %v4039_v44, %v338_v26  ;;  %v3762_v26 = vld [vmem:[#allocation8 + $0x368] ss:$16 sps:$4 sm:$0xff]  }
 0x181   :  { %v4041_v48 = vpop.f32.mrf.mxu1  ;;  %v1426_v49 = vadd.f32 %v1425_v47, %v1385_v45  ;;  %v1553_v50 = vmax.f32 %v1424_v46, 0.0 }
 0x182   :  { %v1427_v51 = vpop.f32.mrf.mxu0  ;;  %v1467_v35 = vadd.f32 %v4041_v48, %v342_v29  ;;  %v3731_v48 = vld [vmem:[#allocation8 + $0x2cc] ss:$16 sps:$4 sm:$0xff]  }
 0x183   :  { %v1468_v52 = vpop.f32.mrf.mxu1  ;;  %v1554_v53 = vmax.f32 %v1426_v49, 0.0  ;;  %v4043_v58 = vpack.c.bf16 %v1553_v50, %v1553_v50  ;;  %v3726_v50 = vld [vmem:[#allocation8 + $0x2e8] ss:$16 sps:$4 sm:$0xff]   ;;  %v3770_v29 = vld [vmem:[#allocation8 + $0x32c] ss:$16 sps:$4 sm:$0xff]  }
 0x184   :  { %v1428_v54 = vpop.f32.mrf.mxu0  ;;  %v3729_v52 = vld [vmem:[#allocation8 + $0x2c8] ss:$16 sps:$4 sm:$0xff]  }
 0x185   :  { %v1469_v55 = vpop.f32.mrf.mxu1  ;;  %v1558_v56 = vpack.c.bf16 %v1554_v53, %v1554_v53  ;;  %v3734_v53 = vld [vmem:[#allocation8 + $0x2ac] ss:$16 sps:$4 sm:$0xff]  }
 0x186   :  { %v3774_v54 = vld [vmem:[#allocation10 + $0x78] sm:$0xff]  }
 0x187   :  { %2383 = vmatprep.mubr.bf16.mxu0 %v1558_v56  ;;  %v3775_v55 = vld [vmem:[#allocation10 + $0x38] sm:$0xff]  }
 0x188   :  { %2384 = vmatmul.mubr.bf16.vlgmr.msra.gmra.mxu0 %v4043_v58 }
 0x189   :  { %2434 = vmatpush1.bf16.msra.mxu0 %v3630_v57  ;;  %2465 = vmatprep.mubr.bf16.mxu0 %v1558_v56  ;;  %v3776_v56 = vld [vmem:[#allocation10 + $0x70] sm:$0xff]   ;;  %v3732_v57 = vld [vmem:[#allocation8 + $0x2a8] ss:$16 sps:$4 sm:$0xff]  }
 0x18a   :  { %2435 = vmatprep.subr.bf16.mxu0 %v3638_v59  ;;  %v3737_v59 = vld [vmem:[#allocation8 + $0x28c] ss:$16 sps:$4 sm:$0xff]  }
 0x18d   :  { %2436 = vmatpush1.bf16.msra.mxu0 %v3636_v60  ;;  %v3777_v60 = vld [vmem:[#allocation10 + $0x30] sm:$0xff]  }
 0x18e   :  { %2437 = vmatprep.subr.bf16.mxu0 %v3644_v61  ;;  %v3735_v61 = vld [vmem:[#allocation8 + $0x288] ss:$16 sps:$4 sm:$0xff]  }
 0x191   :  { %2438 = vmatpush1.bf16.msra.mxu0 %v3642_v62  ;;  %v3740_v62 = vld [vmem:[#allocation8 + $0x26c] ss:$16 sps:$4 sm:$0xff]  }
 0x192   :  { %2439 = vmatprep.subr.bf16.mxu0 %v3650_v63  ;;  %v3779_v63 = vld [vmem:[#allocation10 + $0x28] sm:$0xff]  }
 0x195   :  { %2440 = vmatpush1.bf16.msra.mxu0 %v3648_v0  ;;  %v3780_v0 = vld [vmem:[#allocation10 + $0x60] sm:$0xff]  }
 0x196   :  { %2441 = vmatprep.subr.bf16.mxu0 %v3656_v1  ;;  %v3738_v1 = vld [vmem:[#allocation8 + $0x268] ss:$16 sps:$4 sm:$0xff]  }
 0x199   :  { %2442 = vmatpush1.bf16.msra.mxu0 %v3654_v2  ;;  %v3743_v2 = vld [vmem:[#allocation8 + $0x24c] ss:$16 sps:$4 sm:$0xff]  }
 0x19a   :  { %2443 = vmatprep.subr.bf16.mxu0 %v3662_v4  ;;  %v3781_v4 = vld [vmem:[#allocation10 + $0x20] sm:$0xff]  }
 0x19d   :  { %2444 = vmatpush1.bf16.msra.mxu0 %v3660_v5  ;;  %v3782_v5 = vld [vmem:[#allocation10 + $0x58] sm:$0xff]  }
 0x19e   :  { %2445 = vmatprep.subr.bf16.mxu0 %v3668_v6  ;;  %v3741_v6 = vld [vmem:[#allocation8 + $0x248] ss:$16 sps:$4 sm:$0xff]  }
 0x1a1   :  { %2446 = vmatpush1.bf16.msra.mxu0 %v3666_v7  ;;  %v3746_v7 = vld [vmem:[#allocation8 + $0x22c] ss:$16 sps:$4 sm:$0xff]  }
 0x1a2   :  { %2447 = vmatprep.subr.bf16.mxu0 %v3674_v8  ;;  %v3783_v8 = vld [vmem:[#allocation10 + $0x18] sm:$0xff]  }
 0x1a5   :  { %2448 = vmatpush1.bf16.msra.mxu0 %v3672_v9  ;;  %v3744_v9 = vld [vmem:[#allocation8 + $0x228] ss:$16 sps:$4 sm:$0xff]  }
 0x1a6   :  { %2449 = vmatprep.subr.bf16.mxu0 %v3680_v10  ;;  %v3749_v10 = vld [vmem:[#allocation8 + $0x20c] ss:$16 sps:$4 sm:$0xff]  }
 0x1a9   :  { %2450 = vmatpush2.bf16.msra.mxu0 %v3678_v11  ;;  %v3747_v11 = vld [vmem:[#allocation8 + $0x208] ss:$16 sps:$4 sm:$0xff]  }
 0x1aa   :  { %2451 = vmatprep.subr.bf16.mxu0 %v3686_v12  ;;  %v3752_v12 = vld [vmem:[#allocation8 + $0x3ec] ss:$16 sps:$4 sm:$0xff]  }
 0x1ad   :  { %2452 = vmatpush2.bf16.msra.mxu0 %v3684_v13  ;;  %v3750_v13 = vld [vmem:[#allocation8 + $0x3e8] ss:$16 sps:$4 sm:$0xff]  }
 0x1ae   :  { %2453 = vmatprep.subr.bf16.mxu0 %v3692_v14  ;;  %v3755_v14 = vld [vmem:[#allocation8 + $0x3cc] ss:$16 sps:$4 sm:$0xff]  }
 0x1b1   :  { %2454 = vmatpush2.bf16.msra.mxu0 %v3690_v15  ;;  %v3753_v15 = vld [vmem:[#allocation8 + $0x3c8] ss:$16 sps:$4 sm:$0xff]  }
 0x1b2   :  { %2455 = vmatprep.subr.bf16.mxu0 %v3698_v18  ;;  %v3758_v18 = vld [vmem:[#allocation8 + $0x3ac] ss:$16 sps:$4 sm:$0xff]  }
 0x1b5   :  { %2456 = vmatpush2.bf16.msra.mxu0 %v3696_v19  ;;  %v3756_v19 = vld [vmem:[#allocation8 + $0x3a8] ss:$16 sps:$4 sm:$0xff]  }
 0x1b6   :  { %2457 = vmatprep.subr.bf16.mxu0 %v3704_v20  ;;  %v3761_v20 = vld [vmem:[#allocation8 + $0x38c] ss:$16 sps:$4 sm:$0xff]  }
 0x1b9   :  { %2458 = vmatpush2.bf16.msra.mxu0 %v3702_v22  ;;  %v3759_v22 = vld [vmem:[#allocation8 + $0x388] ss:$16 sps:$4 sm:$0xff]  }
 0x1ba   :  { %2459 = vmatprep.subr.bf16.mxu0 %v3710_v23  ;;  %v3764_v23 = vld [vmem:[#allocation8 + $0x36c] ss:$16 sps:$4 sm:$0xff]  }
 0x1bd   :  { %2460 = vmatpush2.bf16.msra.mxu0 %v3708_v27  ;;  %v3767_v27 = vld [vmem:[#allocation8 + $0x34c] ss:$16 sps:$4 sm:$0xff]  }
 0x1be   :  { %v1505_v32 = vpop.f32.mrf.mxu0  ;;  %2461 = vmatprep.subr.bf16.mxu0 %v3716_v28  ;;  %v3765_v28 = vld [vmem:[#allocation8 + $0x348] ss:$16 sps:$4 sm:$0xff]  }
 0x1bf   :  { %v1546_v33 = vpop.f32.mrf.mxu1  ;;  %v1506_v36 = vadd.f32 %v1505_v32, %v1465_v30  ;;  %v3768_v30 = vld [vmem:[#allocation8 + $0x328] ss:$16 sps:$4 sm:$0xff]  }
 0x1c0   :  { %v1507_v37 = vpop.f32.mrf.mxu0  ;;  %v3771_v32 = vld [vmem:[#allocation8 + $0x308] ss:$16 sps:$4 sm:$0xff]  }
 0x1c1   :  { %v1548_v38 = vpop.f32.mrf.mxu1  ;;  %v1547_v39 = vadd.f32 %v1546_v33, %v1506_v36  ;;  %v1508_v40 = vadd.f32 %v1507_v37, %v1467_v35  ;;  %2462 = vmatpush2.bf16.msra.mxu0 %v3714_v31  ;;  %v3773_v31 = vld [vmem:[#allocation8 + $0x30c] ss:$16 sps:$4 sm:$0xff]   ;;  %v3784_v33 = vld [vmem:[#allocation10 + $0x50] sm:$0xff]   ;;  %v3788_v37 = vld [vmem:[#allocation10 + $0x40] sm:$0xff]  }
 0x1c2   :  { %v1509_v3 = vpop.f32.mrf.mxu0  ;;  %2463 = vmatprep.subr.bf16.mxu0 %v3722_v34  ;;  %v3785_v34 = vld [vmem:[#allocation10 + $0x10] sm:$0xff]   ;;  %v3786_v35 = vld [vmem:[#allocation10 + $0x48] sm:$0xff]  }
 0x1c3   :  { %v1550_v42 = vpop.f32.mrf.mxu1  ;;  %v1549_v17 = vadd.f32 %v1548_v38, %v1508_v40  ;;  %v1555_v44 = vmax.f32 %v1547_v39, 0.0  ;;  %v3787_v36 = vld [vmem:[#allocation10 + $0x8] sm:$0xff]   ;;  %v3789_v38 = vld [vmem:[#allocation10] sm:$0xff]   ;;  %v3790_v39 = vld [vmem:[#allocation10 + $0xf8] sm:$0xff]  }
 0x1c4   :  { %v1510_v45 = vpop.f32.mrf.mxu0  ;;  %v3791_v40 = vld [vmem:[#allocation10 + $0xb8] sm:$0xff]   ;;  %v3793_v3 = vld [vmem:[#allocation10 + $0xb0] sm:$0xff]   ;;  %v3794_v42 = vld [vmem:[#allocation10 + $0xe8] sm:$0xff]  }
 0x1c5   :  { %v1551_v46 = vpop.f32.mrf.mxu1  ;;  %v1556_v47 = vmax.f32 %v1549_v17, 0.0  ;;  %2464 = vmatpush2.bf16.msra.mxu0 %v3720_v41  ;;  %v4056_v51 = vpack.c.bf16 %v1555_v44, %v1555_v44  ;;  %v3792_v41 = vld [vmem:[#allocation10 + $0xf0] sm:$0xff]   ;;  %v3795_v17 = vld [vmem:[#allocation10 + $0xa8] sm:$0xff]   ;;  %v3796_v44 = vld [vmem:[#allocation10 + $0xe0] sm:$0xff]  }
 0x1c6   :  { %3238 = vmatprep.subr.bf16.mxu0 %v3774_v54  ;;  %v3797_v45 = vld [vmem:[#allocation10 + $0xa0] sm:$0xff]   ;;  %v3798_v46 = vld [vmem:[#allocation10 + $0xd8] sm:$0xff]  }
 0x1c7   :  { %v1560_v49 = vpack.c.bf16 %v1556_v47, %v1556_v47  ;;  %v3799_v47 = vld [vmem:[#allocation10 + $0x98] sm:$0xff]  }
 0x1c8   :  { %2466 = vmatmul.mubr.bf16.vlgmr.msra.gmra.mxu0 %v4043_v58  ;;  %v3778_v58 = vld [vmem:[#allocation10 + $0x68] sm:$0xff]  }
 0x1c9   :  { %2424 = vmatprep.mubr.bf16.mxu1 %v1560_v49  ;;  %3239 = vmatpush3.bf16.msra.mxu0 %v3775_v55 }
 0x1ca   :  { %2425 = vmatmul.mubr.bf16.vlgmr.msra.gmra.mxu1 %v4056_v51  ;;  %3240 = vmatprep.subr.bf16.mxu0 %v3776_v56  ;;  %v3804_v56 = vld [vmem:[#allocation10 + $0xc0] sm:$0xff]  }
 0x1cb   :  { %2475 = vmatpush1.bf16.msra.mxu1 %v3726_v50  ;;  %2506 = vmatprep.mubr.bf16.mxu1 %v1560_v49  ;;  %v3800_v49 = vld [vmem:[#allocation10 + $0xd0] sm:$0xff]  }
 0x1cc   :  { %2476 = vmatprep.subr.bf16.mxu1 %v3731_v48  ;;  %v3801_v50 = vld [vmem:[#allocation10 + $0x90] sm:$0xff]  }
 0x1cd   :  { %3241 = vmatpush3.bf16.msra.mxu0 %v3777_v60 }
 0x1ce   :  { %3242 = vmatprep.subr.bf16.mxu0 %v3778_v58 }
 0x1cf   :  { %2477 = vmatpush1.bf16.msra.mxu1 %v3729_v52  ;;  %v3802_v52 = vld [vmem:[#allocation10 + $0xc8] sm:$0xff]  }
 0x1d0   :  { %2478 = vmatprep.subr.bf16.mxu1 %v3734_v53  ;;  %v3803_v53 = vld [vmem:[#allocation10 + $0x88] sm:$0xff]  }
 0x1d1   :  { %3243 = vmatpush3.bf16.msra.mxu0 %v3779_v63 }
 0x1d2   :  { %3244 = vmatprep.subr.bf16.mxu0 %v3780_v0 }
 0x1d3   :  { %2479 = vmatpush1.bf16.msra.mxu1 %v3732_v57  ;;  %v3805_v57 = vld [vmem:[#allocation10 + $0x80] sm:$0xff]  }
 0x1d4   :  { %2480 = vmatprep.subr.bf16.mxu1 %v3737_v59  ;;  %v1689_v59 = vld [vmem:[%s4082_s4] sm:$0xf] }
 0x1d5   :  { %3245 = vmatpush3.bf16.msra.mxu0 %v3781_v4  ;;  %v1694_v60 = vrot.slane %v1689_v59, %v329_v16  ;;  %v1698_v58 = vrot.slane %v1689_v59, %v333_v25  ;;  %v1702_v16 = vrot.slane %v1689_v59, %v337_v21  ;;  %v1706_v25 = vrot.slane %v1689_v59, %v341_v24  ;;  %v3205_v24 = vld [vmem:[%s4084_s6] ss:$0 sm:$0xff] }
 0x1d6   :  { %3246 = vmatprep.subr.bf16.mxu0 %v3782_v5 }
 0x1d7   :  { %2481 = vmatpush1.bf16.msra.mxu1 %v3735_v61 }
 0x1d8   :  { %2482 = vmatprep.subr.bf16.mxu1 %v3740_v62 }
 0x1d9   :  { %3247 = vmatpush3.bf16.msra.mxu0 %v3783_v8 }
 0x1da   :  { %3248 = vmatprep.subr.bf16.mxu0 %v3784_v33 }
 0x1db   :  { %2483 = vmatpush1.bf16.msra.mxu1 %v3738_v1 }
 0x1dc   :  { %2484 = vmatprep.subr.bf16.mxu1 %v3743_v2 }
 0x1dd   :  { %3249 = vmatpush3.bf16.msra.mxu0 %v3785_v34 }
 0x1de   :  { %3250 = vmatprep.subr.bf16.mxu0 %v3786_v35 }
 0x1df   :  { %2485 = vmatpush1.bf16.msra.mxu1 %v3741_v6 }
 0x1e0   :  { %2486 = vmatprep.subr.bf16.mxu1 %v3746_v7 }
 0x1e1   :  { %3251 = vmatpush3.bf16.msra.mxu0 %v3787_v36 }
 0x1e2   :  { %3252 = vmatprep.subr.bf16.mxu0 %v3788_v37 }
 0x1e3   :  { %2487 = vmatpush1.bf16.msra.mxu1 %v3744_v9 }
 0x1e4   :  { %2488 = vmatprep.subr.bf16.mxu1 %v3749_v10 }
 0x1e5   :  { %3253 = vmatpush3.bf16.msra.mxu0 %v3789_v38 }
 0x1e7   :  { %2489 = vmatpush1.bf16.msra.mxu1 %v3747_v11 }
 0x1e8   :  { %2490 = vmatprep.subr.bf16.mxu1 %v3752_v12 }
 0x1eb   :  { %2491 = vmatpush2.bf16.msra.mxu1 %v3750_v13 }
 0x1ec   :  { %2492 = vmatprep.subr.bf16.mxu1 %v3755_v14 }
 0x1ef   :  { %2493 = vmatpush2.bf16.msra.mxu1 %v3753_v15 }
 0x1f0   :  { %2494 = vmatprep.subr.bf16.mxu1 %v3758_v18 }
 0x1f3   :  { %2495 = vmatpush2.bf16.msra.mxu1 %v3756_v19 }
 0x1f4   :  { %2496 = vmatprep.subr.bf16.mxu1 %v3761_v20 }
 0x1f7   :  { %2497 = vmatpush2.bf16.msra.mxu1 %v3759_v22 }
 0x1f8   :  { %2498 = vmatprep.subr.bf16.mxu1 %v3764_v23 }
 0x1fb   :  { %2499 = vmatpush2.bf16.msra.mxu1 %v3762_v26 }
 0x1fc   :  { %2500 = vmatprep.subr.bf16.mxu1 %v3767_v27 }
 0x1ff   :  { %2501 = vmatpush2.bf16.msra.mxu1 %v3765_v28 }
 0x200   :  { %2502 = vmatprep.subr.bf16.mxu1 %v3770_v29 }
 0x203   :  { %2503 = vmatpush2.bf16.msra.mxu1 %v3768_v30 }
 0x204   :  { %2504 = vmatprep.subr.bf16.mxu1 %v3773_v31 }
 0x207   :  { %2505 = vmatpush2.bf16.msra.mxu1 %v3771_v32 }
 0x208   :  { %3260 = vmatprep.subr.bf16.mxu1 %v3790_v39 }
 0x20a   :  { %2507 = vmatmul.mubr.bf16.vlgmr.msra.gmra.mxu1 %v4056_v51 }
 0x20b   :  { %3261 = vmatpush3.bf16.msra.mxu1 %v3791_v40 }
 0x20c   :  { %3262 = vmatprep.subr.bf16.mxu1 %v3792_v41 }
 0x20f   :  { %3263 = vmatpush3.bf16.msra.mxu1 %v3793_v3 }
 0x210   :  { %3264 = vmatprep.subr.bf16.mxu1 %v3794_v42 }
 0x213   :  { %3265 = vmatpush3.bf16.msra.mxu1 %v3795_v17 }
 0x214   :  { %3266 = vmatprep.subr.bf16.mxu1 %v3796_v44 }
 0x217   :  { %3267 = vmatpush3.bf16.msra.mxu1 %v3797_v45 }
 0x218   :  { %3268 = vmatprep.subr.bf16.mxu1 %v3798_v46 }
 0x21b   :  { %3269 = vmatpush3.bf16.msra.mxu1 %v3799_v47 }
 0x21c   :  { %3270 = vmatprep.subr.bf16.mxu1 %v3800_v49 }
 0x21f   :  { %3271 = vmatpush3.bf16.msra.mxu1 %v3801_v50 }
 0x220   :  { %3272 = vmatprep.subr.bf16.mxu1 %v3802_v52 }
 0x223   :  { %3273 = vmatpush3.bf16.msra.mxu1 %v3803_v53 }
 0x224   :  { %3274 = vmatprep.subr.bf16.mxu1 %v3804_v56 }
 0x227   :  { %3275 = vmatpush3.bf16.msra.mxu1 %v3805_v57 }
 0x248   :  { %v2385_v51 = vpop.f32.mrf.mxu0 }
 0x249   :  { %v2386_v62 = vadd.f32 %v2385_v51, %v1694_v60 }
 0x24a   :  { %v2387_v48 = vpop.f32.mrf.mxu0 }
 0x24b   :  { %v2388_v1 = vadd.f32 %v2387_v48, %v1698_v58 }
 0x24c   :  { %v2389_v54 = vpop.f32.mrf.mxu0 }
 0x24e   :  { %v2390_v55 = vpop.f32.mrf.mxu0 }
 0x288   :  { %v2467_v61 = vpop.f32.mrf.mxu0 }
 0x289   :  { %v2468_v14 = vadd.f32 %v2467_v61, %v1702_v16 }
 0x28a   :  { %v2469_v63 = vpop.f32.mrf.mxu0  ;;  %v2426_v0 = vpop.f32.mrf.mxu1 }
 0x28b   :  { %v2427_v2 = vadd.f32 %v2426_v0, %v2386_v62  ;;  %v2470_v18 = vadd.f32 %v2469_v63, %v1706_v25 }
 0x28c   :  { %v2471_v4 = vpop.f32.mrf.mxu0  ;;  %v2428_v5 = vpop.f32.mrf.mxu1 }
 0x28d   :  { %v2429_v6 = vadd.f32 %v2428_v5, %v2388_v1  ;;  %v2515_v7 = vmax.f32 %v2427_v2, 0.0 }
 0x28e   :  { %v2472_v8 = vpop.f32.mrf.mxu0  ;;  %v2430_v9 = vpop.f32.mrf.mxu1 }
 0x28f   :  { %v2516_v10 = vmax.f32 %v2429_v6, 0.0  ;;  %v2519_v13 = vpack.c.bf16 %v2515_v7, %v2515_v7 }
 0x290   :  { %v2431_v11 = vpop.f32.mrf.mxu1 }
 0x291   :  { %v2520_v12 = vpack.c.bf16 %v2516_v10, %v2516_v10 }
 0x293   :  { %2818 = vmatprep.mubr.bf16.mxu0 %v2520_v12 }
 0x294   :  { %2819 = vmatmul.mubr.bf16.vlgmr.msra.gmra.mxu0 %v2519_v13 }
 0x2ca   :  { %v2508_v15 = vpop.f32.mrf.mxu1 }
 0x2cb   :  { %v2509_v19 = vadd.f32 %v2508_v15, %v2468_v14 }
 0x2cc   :  { %v2510_v20 = vpop.f32.mrf.mxu1 }
 0x2cd   :  { %v2511_v22 = vadd.f32 %v2510_v20, %v2470_v18  ;;  %v2517_v23 = vmax.f32 %v2509_v19, 0.0 }
 0x2ce   :  { %v2512_v26 = vpop.f32.mrf.mxu1 }
 0x2cf   :  { %v2518_v27 = vmax.f32 %v2511_v22, 0.0  ;;  %v2521_v30 = vpack.c.bf16 %v2517_v23, %v2517_v23 }
 0x2d0   :  { %v2513_v28 = vpop.f32.mrf.mxu1 }
 0x2d1   :  { %v2522_v29 = vpack.c.bf16 %v2518_v27, %v2518_v27 }
 0x2d3   :  { %2858 = vmatprep.mubr.bf16.mxu1 %v2522_v29 }
 0x2d4   :  { %2859 = vmatmul.mubr.bf16.vlgmr.msra.gmra.mxu1 %v2521_v30 }
 0x354   :  { %v3254_v31 = vpop.f32.mrf.mxu0 }
 0x356   :  { %v3255_v32 = vpop.f32.mrf.mxu0 }
 0x357   :  { %v3256_v43 = vadd.f32 %v3255_v32, %v3254_v31 }
 0x358   :  { %v3257_v21 = vpop.f32.mrf.mxu0 }
 0x359   :  { %v2821_v36 = vadd.f32 %v3256_v43, %v3205_v24 }
 0x35a   :  { %v3258_v33 = vpop.f32.mrf.mxu0 }
 0x394   :  { %v3276_v34 = vpop.f32.mrf.mxu1 }
 0x396   :  { %v3277_v35 = vpop.f32.mrf.mxu1 }
 0x397   :  { %v3278_v37 = vadd.f32 %v3277_v35, %v3276_v34 }
 0x398   :  { %v3279_v38 = vpop.f32.mrf.mxu1 }
 0x399   :  { %v2861_v39 = vadd.f32 %v3278_v37, %v2821_v36 }
 0x39a   :  { %v3280_v40 = vpop.f32.mrf.mxu1 }
 0x39b   :  { %2866 = vst [vmem:[#allocation11] sm:$0x3] %v2861_v39 }
 0x39c   :  { %3917 = shalt.err (!%p3914_p1)
}
 0x39d   :  { %2876 = dma.vmem_to_hbm [thread:$0]  %s2874_s29, 32, %s4085_s7, [#allocation4]  }
 0x39e   :  { %3932 = dma.done.wait [#allocation4], 32  }
 0x39f   :  { %3933 = vsyncadd [#allocation4], 4294967264 }
 0x3a0   :  { %2880 = vsyncpa [#allocation3], 1 }
 0x3a1   :  { %2881 = vsyncpa [#allocation6], 1 }
 0x3a2   :  { %2882 = vsyncpa [#allocation9], 1 }
 0x3a3   :  { %2883 = vsyncpa [#allocation4], 1 }

</bundles_post_ra>
